<compile_context>
chip_gen: v7x
topology: tpu7x:2x2x1
jax: 0.10.0
libtpu: 0.0.40
codegen_flags: <defaults>
</compile_context>

<pallas_src>
import jax
import jax.numpy as jnp
from jax import lax
from jax.experimental import pallas as pl
from jax.experimental.pallas import tpu as pltpu

K = 3        # conv kernel size
PAD = 1      # conv padding
EPS = 1e-5   # InstanceNorm3d default eps (affine=False, no running stats)


def _banded_weight(w, W):
    """Fold the 3x3x3 taps into one 2-D matmul weight.

    w: (Cout, Cin, 3, 3, 3) torch Conv3d layout.
    Returns B2d of shape (9*(W+2)*Cin, W*Cout) such that, with the padded slab matrix
    P[(d*H+h), ((kd*3+kh)*(W+2) + w')*Cin + ci] = xpad[d+kd, h+kh, w', ci],
    P @ B2d equals conv3d(x, w, padding=1) laid out as (D*H, W*Cout).
    """
    Cout, Cin = int(w.shape[0]), int(w.shape[1])
    Wp = W + 2 * PAD
    wt = jnp.transpose(w, (2, 3, 4, 1, 0))               # (kd, kh, kw, Cin, Cout)
    B = jnp.zeros((K, K, Wp, Cin, W, Cout), w.dtype)
    for kw in range(K):
        for wo in range(W):
            B = B.at[:, :, wo + kw, :, wo, :].set(wt[:, :, kw, :, :])
    return B.reshape(K * K * Wp * Cin, W * Cout)


def _make_kernel(D, H, W, Cin, Cout):
    Wp = W + 2 * PAD
    S = float(D * H * W)

    def store_padded(scr, val, c):
        # scr: (D+2, H+2, (W+2)*c) VMEM ref; val: (D, H, W*c).
        # Re-zero only the thin halo (interior is fully overwritten each grid step).
        Dp, Hp, WpC = scr.shape
        scr[0:1, :, :] = jnp.zeros((1, Hp, WpC), scr.dtype)
        scr[Dp - 1:Dp, :, :] = jnp.zeros((1, Hp, WpC), scr.dtype)
        scr[:, 0:1, :] = jnp.zeros((Dp, 1, WpC), scr.dtype)
        scr[:, Hp - 1:Hp, :] = jnp.zeros((Dp, 1, WpC), scr.dtype)
        scr[:, :, 0:c] = jnp.zeros((Dp, Hp, c), scr.dtype)
        scr[:, :, WpC - c:WpC] = jnp.zeros((Dp, Hp, c), scr.dtype)
        scr[PAD:PAD + D, PAD:PAD + H, c:c + W * c] = val

    def conv_in_relu(scr, wband, c):
        # One 3x3x3 conv as a single MXU matmul against block-banded weights, then
        # InstanceNorm3d (biased variance, eps inside rsqrt, affine=False) and ReLU.
        # scr: (D+2, H+2, (W+2)*c) padded activations, lanes = (w, channel).
        slabs = [
            scr[kd:kd + D, kh:kh + H, :].reshape(D * H, Wp * c)
            for kd in range(K) for kh in range(K)
        ]
        p = jnp.concatenate(slabs, axis=-1)                         # (D*H, 9*(W+2)*c)
        y = jnp.dot(p, wband, preferred_element_type=jnp.float32)   # (D*H, W*Cout)

        def fold_w(v):                                              # (1, W*Cout) -> (1, Cout)
            acc = v[:, 0:Cout]
            for wo in range(1, W):
                acc = acc + v[:, wo * Cout:(wo + 1) * Cout]
            return acc

        mean = fold_w(jnp.sum(y, axis=0, keepdims=True)) * (1.0 / S)     # (1, Cout)
        mean_b = jnp.concatenate([mean] * W, axis=-1)                    # (1, W*Cout)
        dev = y - mean_b
        var = fold_w(jnp.sum(dev * dev, axis=0, keepdims=True)) * (1.0 / S)
        inv_b = jnp.concatenate([lax.rsqrt(var + EPS)] * W, axis=-1)     # (1, W*Cout)
        return jnp.maximum(dev * inv_b, 0.0)                             # (D*H, W*Cout)

    def kernel(x_ref, w1_ref, w2_ref, o_ref, scr1, scr2):
        # stage 1: pad input into zero-haloed scratch, conv + InstanceNorm + ReLU
        store_padded(scr1, x_ref[0], Cin)
        y1 = conv_in_relu(scr1, w1_ref[...], Cin)                   # (D*H, W*Cout)
        # stage 2: same, from the normalized intermediate
        store_padded(scr2, y1.reshape(D, H, W * Cout), Cout)
        y2 = conv_in_relu(scr2, w2_ref[...], Cout)
        o_ref[0] = y2.astype(o_ref.dtype)

    return kernel


@jax.jit
def double_conv(x_ncdhw, w1, b1, w2, b2):
    """DoubleConv forward.  x: (N, Cin, D, H, W); w1: (Cout, Cin, 3,3,3); w2: (Cout, Cout, 3,3,3).
    b1/b2 are accepted for API parity with nn.Conv3d but unused: a per-channel bias added
    right before InstanceNorm is exactly removed by the mean subtraction."""
    del b1, b2
    N, Cin, D, H, W = x_ncdhw.shape
    Cout = w1.shape[0]
    Wp = W + 2 * PAD

    # NCDHW -> (N, D, H, W*Cin): channels-last with W and C merged into the lane dim.
    # TODO(synk): fold this layout change (and the inverse below) into the surrounding
    # model by keeping activations channels-last end-to-end.
    xr = jnp.transpose(x_ncdhw, (0, 2, 3, 4, 1)).reshape(N, D, H, W * Cin)

    w1b = _banded_weight(w1, W)    # (9*(W+2)*Cin,  W*Cout)
    w2b = _banded_weight(w2, W)    # (9*(W+2)*Cout, W*Cout)

    kernel = _make_kernel(D, H, W, Cin, Cout)

    out = pl.pallas_call(
        kernel,
        out_shape=jax.ShapeDtypeStruct((N, D * H, W * Cout), x_ncdhw.dtype),
        grid_spec=pltpu.PrefetchScalarGridSpec(
            num_scalar_prefetch=0,
            grid=(N,),
            in_specs=[
                pl.BlockSpec((1, D, H, W * Cin), lambda n: (n, 0, 0, 0)),
                pl.BlockSpec((K * K * Wp * Cin, W * Cout), lambda n: (0, 0)),
                pl.BlockSpec((K * K * Wp * Cout, W * Cout), lambda n: (0, 0)),
            ],
            out_specs=pl.BlockSpec((1, D * H, W * Cout), lambda n: (n, 0, 0)),
            scratch_shapes=[
                pltpu.VMEM((D + 2 * PAD, H + 2 * PAD, Wp * Cin), jnp.float32),
                pltpu.VMEM((D + 2 * PAD, H + 2 * PAD, Wp * Cout), jnp.float32),
            ],
        ),
        compiler_params=pltpu.CompilerParams(
            dimension_semantics=("parallel",),
            vmem_limit_bytes=32 * 1024 * 1024,
        ),
    )(xr, w1b, w2b)

    # (N, D*H, W*Cout) -> NCDHW
    out = out.reshape(N, D, H, W, Cout)
    return jnp.transpose(out, (0, 4, 1, 2, 3))


def _reference(x, w1, b1, w2, b2):
    """Pure-JAX reference: Conv3d(+bias) -> InstanceNorm3d -> ReLU, twice."""
    dn = ("NCDHW", "OIDHW", "NCDHW")

    def block(x, w, b):
        y = lax.conv_general_dilated(
            x, w, window_strides=(1, 1, 1), padding=[(PAD, PAD)] * 3,
            dimension_numbers=dn, precision=lax.Precision.HIGHEST)
        y = y + b[None, :, None, None, None]
        m = jnp.mean(y, axis=(2, 3, 4), keepdims=True)
        v = jnp.mean((y - m) ** 2, axis=(2, 3, 4), keepdims=True)
        return jnp.maximum((y - m) * lax.rsqrt(v + EPS), 0.0)

    return block(block(x, w1, b1), w2, b2)


if __name__ == "__main__":
    N, Cin, Cout, D, H, W = 2, 4, 8, 8, 8, 8

    key = jax.random.PRNGKey(0)
    kx, kw1, kb1, kw2, kb2 = jax.random.split(key, 5)

    x = jax.random.normal(kx, (N, Cin, D, H, W), jnp.float32)

    fan1 = Cin * K ** 3
    w1 = jax.random.uniform(kw1, (Cout, Cin, K, K, K), jnp.float32, -1.0, 1.0) / jnp.sqrt(fan1)
    b1 = jax.random.uniform(kb1, (Cout,), jnp.float32, -1.0, 1.0) / jnp.sqrt(fan1)
    fan2 = Cout * K ** 3
    w2 = jax.random.uniform(kw2, (Cout, Cout, K, K, K), jnp.float32, -1.0, 1.0) / jnp.sqrt(fan2)
    b2 = jax.random.uniform(kb2, (Cout,), jnp.float32, -1.0, 1.0) / jnp.sqrt(fan2)

    out = double_conv(x, w1, b1, w2, b2)
    jax.block_until_ready(out)
    assert out.shape == (N, Cout, D, H, W)

    # Correctness check vs. pure-JAX reference (IN-normalized outputs are O(1); the loose
    # tolerance only absorbs MXU f32-pass rounding — any indexing/normalization bug
    # would produce O(1) errors).
    ref = _reference(x, w1, b1, w2, b2)
    err = float(jnp.max(jnp.abs(out - ref)))
    assert err < 2e-2, f"max abs error vs reference: {err}"
    print("KERNEL_OK")
</pallas_src>

<mosaic_0001>
module attributes {stable_mosaic.version = 11 : i64} {
  func.func @kernel(%arg0: i32, %arg1: memref<1x8x8x32xf32, #tpu.memory_space<vmem>>, %arg2: memref<360x64xf32, #tpu.memory_space<vmem>>, %arg3: memref<720x64xf32, #tpu.memory_space<vmem>>, %arg4: memref<1x64x64xf32, #tpu.memory_space<vmem>>, %arg5: memref<10x10x40xf32, #tpu.memory_space<vmem>>, %arg6: memref<10x10x80xf32, #tpu.memory_space<vmem>>) attributes {dimension_semantics = [#tpu.dimension_semantics<parallel>], iteration_bounds = array<i64: 2>, scalar_prefetch = 0 : i64, scratch_operands = 2 : i64, tpu.core_type = #tpu.core_type<tc>, window_params = [{transform_indices = @transform_0, window_bounds = array<i64: 1, 8, 8, 32>}, {pipeline_mode = #tpu.pipeline_mode<synchronous>, transform_indices = @transform_1, window_bounds = array<i64: 360, 64>}, {pipeline_mode = #tpu.pipeline_mode<synchronous>, transform_indices = @transform_2, window_bounds = array<i64: 720, 64>}, {transform_indices = @transform_3, window_bounds = array<i64: 1, 64, 64>}]} {
    %c0 = arith.constant 0 : index
    %c0_0 = arith.constant 0 : index
    %c0_1 = arith.constant 0 : index
    %c0_2 = arith.constant 0 : index
    %0 = vector.load %arg1[%c0, %c0_0, %c0_1, %c0_2] : memref<1x8x8x32xf32, #tpu.memory_space<vmem>>, vector<1x8x8x32xf32>
    %1 = vector.shape_cast %0 : vector<1x8x8x32xf32> to vector<8x8x32xf32>
    %cst = arith.constant 0.000000e+00 : f32
    %2 = vector.broadcast %cst : f32 to vector<1x10x40xf32>
    %c0_3 = arith.constant 0 : index
    %c0_4 = arith.constant 0 : index
    %c0_5 = arith.constant 0 : index
    %3 = vector.load %arg5[%c0_3, %c0_4, %c0_5] : memref<10x10x40xf32, #tpu.memory_space<vmem>>, vector<1x10x40xf32>
    tpu.vector_store %arg5[%c0_3, %c0_4, %c0_5], %2 {strides = array<i32>} : memref<10x10x40xf32, #tpu.memory_space<vmem>>, vector<1x10x40xf32>,
    %cst_6 = arith.constant 0.000000e+00 : f32
    %4 = vector.broadcast %cst_6 : f32 to vector<1x10x40xf32>
    %c9 = arith.constant 9 : index
    %c0_7 = arith.constant 0 : index
    %c0_8 = arith.constant 0 : index
    %5 = vector.load %arg5[%c9, %c0_7, %c0_8] : memref<10x10x40xf32, #tpu.memory_space<vmem>>, vector<1x10x40xf32>
    tpu.vector_store %arg5[%c9, %c0_7, %c0_8], %4 {strides = array<i32>} : memref<10x10x40xf32, #tpu.memory_space<vmem>>, vector<1x10x40xf32>,
    %cst_9 = arith.constant 0.000000e+00 : f32
    %6 = vector.broadcast %cst_9 : f32 to vector<10x1x40xf32>
    %c0_10 = arith.constant 0 : index
    %c0_11 = arith.constant 0 : index
    %c0_12 = arith.constant 0 : index
    %7 = vector.load %arg5[%c0_10, %c0_11, %c0_12] : memref<10x10x40xf32, #tpu.memory_space<vmem>>, vector<10x1x40xf32>
    tpu.vector_store %arg5[%c0_10, %c0_11, %c0_12], %6 {strides = array<i32>} : memref<10x10x40xf32, #tpu.memory_space<vmem>>, vector<10x1x40xf32>,
    %cst_13 = arith.constant 0.000000e+00 : f32
    %8 = vector.broadcast %cst_13 : f32 to vector<10x1x40xf32>
    %c0_14 = arith.constant 0 : index
    %c9_15 = arith.constant 9 : index
    %c0_16 = arith.constant 0 : index
    %9 = vector.load %arg5[%c0_14, %c9_15, %c0_16] : memref<10x10x40xf32, #tpu.memory_space<vmem>>, vector<10x1x40xf32>
    tpu.vector_store %arg5[%c0_14, %c9_15, %c0_16], %8 {strides = array<i32>} : memref<10x10x40xf32, #tpu.memory_space<vmem>>, vector<10x1x40xf32>,
    %cst_17 = arith.constant 0.000000e+00 : f32
    %10 = vector.broadcast %cst_17 : f32 to vector<10x10x4xf32>
    %c0_18 = arith.constant 0 : index
    %c0_19 = arith.constant 0 : index
    %c0_20 = arith.constant 0 : index
    %11 = vector.load %arg5[%c0_18, %c0_19, %c0_20] : memref<10x10x40xf32, #tpu.memory_space<vmem>>, vector<10x10x4xf32>
    tpu.vector_store %arg5[%c0_18, %c0_19, %c0_20], %10 {strides = array<i32>} : memref<10x10x40xf32, #tpu.memory_space<vmem>>, vector<10x10x4xf32>,
    %cst_21 = arith.constant 0.000000e+00 : f32
    %12 = vector.broadcast %cst_21 : f32 to vector<10x10x4xf32>
    %c0_22 = arith.constant 0 : index
    %c0_23 = arith.constant 0 : index
    %c36 = arith.constant 36 : index
    %13 = vector.load %arg5[%c0_22, %c0_23, %c36] : memref<10x10x40xf32, #tpu.memory_space<vmem>>, vector<10x10x4xf32>
    tpu.vector_store %arg5[%c0_22, %c0_23, %c36], %12 {strides = array<i32>} : memref<10x10x40xf32, #tpu.memory_space<vmem>>, vector<10x10x4xf32>,
    %c1 = arith.constant 1 : index
    %c1_24 = arith.constant 1 : index
    %c4 = arith.constant 4 : index
    %14 = vector.load %arg5[%c1, %c1_24, %c4] : memref<10x10x40xf32, #tpu.memory_space<vmem>>, vector<8x8x32xf32>
    tpu.vector_store %arg5[%c1, %c1_24, %c4], %1 {strides = array<i32>} : memref<10x10x40xf32, #tpu.memory_space<vmem>>, vector<8x8x32xf32>,
    %c0_25 = arith.constant 0 : index
    %c0_26 = arith.constant 0 : index
    %15 = vector.load %arg2[%c0_25, %c0_26] : memref<360x64xf32, #tpu.memory_space<vmem>>, vector<360x64xf32>
    %c0_27 = arith.constant 0 : index
    %c0_28 = arith.constant 0 : index
    %c0_29 = arith.constant 0 : index
    %16 = vector.load %arg5[%c0_27, %c0_28, %c0_29] : memref<10x10x40xf32, #tpu.memory_space<vmem>>, vector<8x8x40xf32>
    %17 = vector.shape_cast %16 : vector<8x8x40xf32> to vector<64x40xf32>
    %c0_30 = arith.constant 0 : index
    %c1_31 = arith.constant 1 : index
    %c0_32 = arith.constant 0 : index
    %18 = vector.load %arg5[%c0_30, %c1_31, %c0_32] : memref<10x10x40xf32, #tpu.memory_space<vmem>>, vector<8x8x40xf32>
    %19 = vector.shape_cast %18 : vector<8x8x40xf32> to vector<64x40xf32>
    %c0_33 = arith.constant 0 : index
    %c2 = arith.constant 2 : index
    %c0_34 = arith.constant 0 : index
    %20 = vector.load %arg5[%c0_33, %c2, %c0_34] : memref<10x10x40xf32, #tpu.memory_space<vmem>>, vector<8x8x40xf32>
    %21 = vector.shape_cast %20 : vector<8x8x40xf32> to vector<64x40xf32>
    %c1_35 = arith.constant 1 : index
    %c0_36 = arith.constant 0 : index
    %c0_37 = arith.constant 0 : index
    %22 = vector.load %arg5[%c1_35, %c0_36, %c0_37] : memref<10x10x40xf32, #tpu.memory_space<vmem>>, vector<8x8x40xf32>
    %23 = vector.shape_cast %22 : vector<8x8x40xf32> to vector<64x40xf32>
    %c1_38 = arith.constant 1 : index
    %c1_39 = arith.constant 1 : index
    %c0_40 = arith.constant 0 : index
    %24 = vector.load %arg5[%c1_38, %c1_39, %c0_40] : memref<10x10x40xf32, #tpu.memory_space<vmem>>, vector<8x8x40xf32>
    %25 = vector.shape_cast %24 : vector<8x8x40xf32> to vector<64x40xf32>
    %c1_41 = arith.constant 1 : index
    %c2_42 = arith.constant 2 : index
    %c0_43 = arith.constant 0 : index
    %26 = vector.load %arg5[%c1_41, %c2_42, %c0_43] : memref<10x10x40xf32, #tpu.memory_space<vmem>>, vector<8x8x40xf32>
    %27 = vector.shape_cast %26 : vector<8x8x40xf32> to vector<64x40xf32>
    %c2_44 = arith.constant 2 : index
    %c0_45 = arith.constant 0 : index
    %c0_46 = arith.constant 0 : index
    %28 = vector.load %arg5[%c2_44, %c0_45, %c0_46] : memref<10x10x40xf32, #tpu.memory_space<vmem>>, vector<8x8x40xf32>
    %29 = vector.shape_cast %28 : vector<8x8x40xf32> to vector<64x40xf32>
    %c2_47 = arith.constant 2 : index
    %c1_48 = arith.constant 1 : index
    %c0_49 = arith.constant 0 : index
    %30 = vector.load %arg5[%c2_47, %c1_48, %c0_49] : memref<10x10x40xf32, #tpu.memory_space<vmem>>, vector<8x8x40xf32>
    %31 = vector.shape_cast %30 : vector<8x8x40xf32> to vector<64x40xf32>
    %c2_50 = arith.constant 2 : index
    %c2_51 = arith.constant 2 : index
    %c0_52 = arith.constant 0 : index
    %32 = vector.load %arg5[%c2_50, %c2_51, %c0_52] : memref<10x10x40xf32, #tpu.memory_space<vmem>>, vector<8x8x40xf32>
    %33 = vector.shape_cast %32 : vector<8x8x40xf32> to vector<64x40xf32>
    %34 = tpu.concatenate %17, %19, %21, %23, %25, %27, %29, %31, %33 in 1 : vector<64x40xf32>, vector<64x40xf32>, vector<64x40xf32>, vector<64x40xf32>, vector<64x40xf32>, vector<64x40xf32>, vector<64x40xf32>, vector<64x40xf32>, vector<64x40xf32> -> vector<64x360xf32>
    %cst_53 = arith.constant dense<0.000000e+00> : vector<64x64xf32>
    %35 = tpu.matmul %34, %15, %cst_53 {dimension_numbers = #tpu.dot_dimension_numbers<[1], [0], [0], [1], [0, 0, 1, 1], [], []>} : vector<64x360xf32>, vector<360x64xf32>, vector<64x64xf32> -> vector<64x64xf32>
    %cst_54 = arith.constant dense<0.000000e+00> : vector<64xf32>
    %36 = vector.multi_reduction <add>, %35, %cst_54 [0] : vector<64x64xf32> to vector<64xf32>
    %37 = vector.shape_cast %36 : vector<64xf32> to vector<1x64xf32>
    %38 = vector.extract_strided_slice %37 {offsets = [0, 0], sizes = [1, 8], strides = [1, 1]} : vector<1x64xf32> to vector<1x8xf32>
    %39 = vector.extract_strided_slice %37 {offsets = [0, 8], sizes = [1, 8], strides = [1, 1]} : vector<1x64xf32> to vector<1x8xf32>
    %40 = arith.addf %38, %39 : vector<1x8xf32>
    %41 = vector.extract_strided_slice %37 {offsets = [0, 16], sizes = [1, 8], strides = [1, 1]} : vector<1x64xf32> to vector<1x8xf32>
    %42 = arith.addf %40, %41 : vector<1x8xf32>
    %43 = vector.extract_strided_slice %37 {offsets = [0, 24], sizes = [1, 8], strides = [1, 1]} : vector<1x64xf32> to vector<1x8xf32>
    %44 = arith.addf %42, %43 : vector<1x8xf32>
    %45 = vector.extract_strided_slice %37 {offsets = [0, 32], sizes = [1, 8], strides = [1, 1]} : vector<1x64xf32> to vector<1x8xf32>
    %46 = arith.addf %44, %45 : vector<1x8xf32>
    %47 = vector.extract_strided_slice %37 {offsets = [0, 40], sizes = [1, 8], strides = [1, 1]} : vector<1x64xf32> to vector<1x8xf32>
    %48 = arith.addf %46, %47 : vector<1x8xf32>
    %49 = vector.extract_strided_slice %37 {offsets = [0, 48], sizes = [1, 8], strides = [1, 1]} : vector<1x64xf32> to vector<1x8xf32>
    %50 = arith.addf %48, %49 : vector<1x8xf32>
    %51 = vector.extract_strided_slice %37 {offsets = [0, 56], sizes = [1, 8], strides = [1, 1]} : vector<1x64xf32> to vector<1x8xf32>
    %52 = arith.addf %50, %51 : vector<1x8xf32>
    %cst_55 = arith.constant 0.001953125 : f32
    %53 = vector.broadcast %cst_55 : f32 to vector<1x8xf32>
    %54 = arith.mulf %52, %53 : vector<1x8xf32>
    %55 = tpu.concatenate %54, %54, %54, %54, %54, %54, %54, %54 in 1 : vector<1x8xf32>, vector<1x8xf32>, vector<1x8xf32>, vector<1x8xf32>, vector<1x8xf32>, vector<1x8xf32>, vector<1x8xf32>, vector<1x8xf32> -> vector<1x64xf32>
    %56 = vector.broadcast %55 : vector<1x64xf32> to vector<64x64xf32>
    %57 = arith.subf %35, %56 : vector<64x64xf32>
    %58 = arith.mulf %57, %57 : vector<64x64xf32>
    %cst_56 = arith.constant dense<0.000000e+00> : vector<64xf32>
    %59 = vector.multi_reduction <add>, %58, %cst_56 [0] : vector<64x64xf32> to vector<64xf32>
    %60 = vector.shape_cast %59 : vector<64xf32> to vector<1x64xf32>
    %61 = vector.extract_strided_slice %60 {offsets = [0, 0], sizes = [1, 8], strides = [1, 1]} : vector<1x64xf32> to vector<1x8xf32>
    %62 = vector.extract_strided_slice %60 {offsets = [0, 8], sizes = [1, 8], strides = [1, 1]} : vector<1x64xf32> to vector<1x8xf32>
    %63 = arith.addf %61, %62 : vector<1x8xf32>
    %64 = vector.extract_strided_slice %60 {offsets = [0, 16], sizes = [1, 8], strides = [1, 1]} : vector<1x64xf32> to vector<1x8xf32>
    %65 = arith.addf %63, %64 : vector<1x8xf32>
    %66 = vector.extract_strided_slice %60 {offsets = [0, 24], sizes = [1, 8], strides = [1, 1]} : vector<1x64xf32> to vector<1x8xf32>
    %67 = arith.addf %65, %66 : vector<1x8xf32>
    %68 = vector.extract_strided_slice %60 {offsets = [0, 32], sizes = [1, 8], strides = [1, 1]} : vector<1x64xf32> to vector<1x8xf32>
    %69 = arith.addf %67, %68 : vector<1x8xf32>
    %70 = vector.extract_strided_slice %60 {offsets = [0, 40], sizes = [1, 8], strides = [1, 1]} : vector<1x64xf32> to vector<1x8xf32>
    %71 = arith.addf %69, %70 : vector<1x8xf32>
    %72 = vector.extract_strided_slice %60 {offsets = [0, 48], sizes = [1, 8], strides = [1, 1]} : vector<1x64xf32> to vector<1x8xf32>
    %73 = arith.addf %71, %72 : vector<1x8xf32>
    %74 = vector.extract_strided_slice %60 {offsets = [0, 56], sizes = [1, 8], strides = [1, 1]} : vector<1x64xf32> to vector<1x8xf32>
    %75 = arith.addf %73, %74 : vector<1x8xf32>
    %cst_57 = arith.constant 0.001953125 : f32
    %76 = vector.broadcast %cst_57 : f32 to vector<1x8xf32>
    %77 = arith.mulf %75, %76 : vector<1x8xf32>
    %cst_58 = arith.constant 9.99999974E-6 : f32
    %78 = vector.broadcast %cst_58 : f32 to vector<1x8xf32>
    %79 = arith.addf %77, %78 : vector<1x8xf32>
    %80 = math.rsqrt %79 : vector<1x8xf32>
    %81 = tpu.concatenate %80, %80, %80, %80, %80, %80, %80, %80 in 1 : vector<1x8xf32>, vector<1x8xf32>, vector<1x8xf32>, vector<1x8xf32>, vector<1x8xf32>, vector<1x8xf32>, vector<1x8xf32>, vector<1x8xf32> -> vector<1x64xf32>
    %82 = vector.broadcast %81 : vector<1x64xf32> to vector<64x64xf32>
    %83 = arith.mulf %57, %82 : vector<64x64xf32>
    %cst_59 = arith.constant 0.000000e+00 : f32
    %84 = vector.broadcast %cst_59 : f32 to vector<64x64xf32>
    %85 = arith.maximumf %83, %84 : vector<64x64xf32>
    %86 = vector.shape_cast %85 : vector<64x64xf32> to vector<8x8x64xf32>
    %cst_60 = arith.constant 0.000000e+00 : f32
    %87 = vector.broadcast %cst_60 : f32 to vector<1x10x80xf32>
    %c0_61 = arith.constant 0 : index
    %c0_62 = arith.constant 0 : index
    %c0_63 = arith.constant 0 : index
    %88 = vector.load %arg6[%c0_61, %c0_62, %c0_63] : memref<10x10x80xf32, #tpu.memory_space<vmem>>, vector<1x10x80xf32>
    tpu.vector_store %arg6[%c0_61, %c0_62, %c0_63], %87 {strides = array<i32>} : memref<10x10x80xf32, #tpu.memory_space<vmem>>, vector<1x10x80xf32>,
    %cst_64 = arith.constant 0.000000e+00 : f32
    %89 = vector.broadcast %cst_64 : f32 to vector<1x10x80xf32>
    %c9_65 = arith.constant 9 : index
    %c0_66 = arith.constant 0 : index
    %c0_67 = arith.constant 0 : index
    %90 = vector.load %arg6[%c9_65, %c0_66, %c0_67] : memref<10x10x80xf32, #tpu.memory_space<vmem>>, vector<1x10x80xf32>
    tpu.vector_store %arg6[%c9_65, %c0_66, %c0_67], %89 {strides = array<i32>} : memref<10x10x80xf32, #tpu.memory_space<vmem>>, vector<1x10x80xf32>,
    %cst_68 = arith.constant 0.000000e+00 : f32
    %91 = vector.broadcast %cst_68 : f32 to vector<10x1x80xf32>
    %c0_69 = arith.constant 0 : index
    %c0_70 = arith.constant 0 : index
    %c0_71 = arith.constant 0 : index
    %92 = vector.load %arg6[%c0_69, %c0_70, %c0_71] : memref<10x10x80xf32, #tpu.memory_space<vmem>>, vector<10x1x80xf32>
    tpu.vector_store %arg6[%c0_69, %c0_70, %c0_71], %91 {strides = array<i32>} : memref<10x10x80xf32, #tpu.memory_space<vmem>>, vector<10x1x80xf32>,
    %cst_72 = arith.constant 0.000000e+00 : f32
    %93 = vector.broadcast %cst_72 : f32 to vector<10x1x80xf32>
    %c0_73 = arith.constant 0 : index
    %c9_74 = arith.constant 9 : index
    %c0_75 = arith.constant 0 : index
    %94 = vector.load %arg6[%c0_73, %c9_74, %c0_75] : memref<10x10x80xf32, #tpu.memory_space<vmem>>, vector<10x1x80xf32>
    tpu.vector_store %arg6[%c0_73, %c9_74, %c0_75], %93 {strides = array<i32>} : memref<10x10x80xf32, #tpu.memory_space<vmem>>, vector<10x1x80xf32>,
    %cst_76 = arith.constant 0.000000e+00 : f32
    %95 = vector.broadcast %cst_76 : f32 to vector<10x10x8xf32>
    %c0_77 = arith.constant 0 : index
    %c0_78 = arith.constant 0 : index
    %c0_79 = arith.constant 0 : index
    %96 = vector.load %arg6[%c0_77, %c0_78, %c0_79] : memref<10x10x80xf32, #tpu.memory_space<vmem>>, vector<10x10x8xf32>
    tpu.vector_store %arg6[%c0_77, %c0_78, %c0_79], %95 {strides = array<i32>} : memref<10x10x80xf32, #tpu.memory_space<vmem>>, vector<10x10x8xf32>,
    %cst_80 = arith.constant 0.000000e+00 : f32
    %97 = vector.broadcast %cst_80 : f32 to vector<10x10x8xf32>
    %c0_81 = arith.constant 0 : index
    %c0_82 = arith.constant 0 : index
    %c72 = arith.constant 72 : index
    %98 = vector.load %arg6[%c0_81, %c0_82, %c72] : memref<10x10x80xf32, #tpu.memory_space<vmem>>, vector<10x10x8xf32>
    tpu.vector_store %arg6[%c0_81, %c0_82, %c72], %97 {strides = array<i32>} : memref<10x10x80xf32, #tpu.memory_space<vmem>>, vector<10x10x8xf32>,
    %c1_83 = arith.constant 1 : index
    %c1_84 = arith.constant 1 : index
    %c8 = arith.constant 8 : index
    %99 = vector.load %arg6[%c1_83, %c1_84, %c8] : memref<10x10x80xf32, #tpu.memory_space<vmem>>, vector<8x8x64xf32>
    tpu.vector_store %arg6[%c1_83, %c1_84, %c8], %86 {strides = array<i32>} : memref<10x10x80xf32, #tpu.memory_space<vmem>>, vector<8x8x64xf32>,
    %c0_85 = arith.constant 0 : index
    %c0_86 = arith.constant 0 : index
    %100 = vector.load %arg3[%c0_85, %c0_86] : memref<720x64xf32, #tpu.memory_space<vmem>>, vector<720x64xf32>
    %c0_87 = arith.constant 0 : index
    %c0_88 = arith.constant 0 : index
    %c0_89 = arith.constant 0 : index
    %101 = vector.load %arg6[%c0_87, %c0_88, %c0_89] : memref<10x10x80xf32, #tpu.memory_space<vmem>>, vector<8x8x80xf32>
    %102 = vector.shape_cast %101 : vector<8x8x80xf32> to vector<64x80xf32>
    %c0_90 = arith.constant 0 : index
    %c1_91 = arith.constant 1 : index
    %c0_92 = arith.constant 0 : index
    %103 = vector.load %arg6[%c0_90, %c1_91, %c0_92] : memref<10x10x80xf32, #tpu.memory_space<vmem>>, vector<8x8x80xf32>
    %104 = vector.shape_cast %103 : vector<8x8x80xf32> to vector<64x80xf32>
    %c0_93 = arith.constant 0 : index
    %c2_94 = arith.constant 2 : index
    %c0_95 = arith.constant 0 : index
    %105 = vector.load %arg6[%c0_93, %c2_94, %c0_95] : memref<10x10x80xf32, #tpu.memory_space<vmem>>, vector<8x8x80xf32>
    %106 = vector.shape_cast %105 : vector<8x8x80xf32> to vector<64x80xf32>
    %c1_96 = arith.constant 1 : index
    %c0_97 = arith.constant 0 : index
    %c0_98 = arith.constant 0 : index
    %107 = vector.load %arg6[%c1_96, %c0_97, %c0_98] : memref<10x10x80xf32, #tpu.memory_space<vmem>>, vector<8x8x80xf32>
    %108 = vector.shape_cast %107 : vector<8x8x80xf32> to vector<64x80xf32>
    %c1_99 = arith.constant 1 : index
    %c1_100 = arith.constant 1 : index
    %c0_101 = arith.constant 0 : index
    %109 = vector.load %arg6[%c1_99, %c1_100, %c0_101] : memref<10x10x80xf32, #tpu.memory_space<vmem>>, vector<8x8x80xf32>
    %110 = vector.shape_cast %109 : vector<8x8x80xf32> to vector<64x80xf32>
    %c1_102 = arith.constant 1 : index
    %c2_103 = arith.constant 2 : index
    %c0_104 = arith.constant 0 : index
    %111 = vector.load %arg6[%c1_102, %c2_103, %c0_104] : memref<10x10x80xf32, #tpu.memory_space<vmem>>, vector<8x8x80xf32>
    %112 = vector.shape_cast %111 : vector<8x8x80xf32> to vector<64x80xf32>
    %c2_105 = arith.constant 2 : index
    %c0_106 = arith.constant 0 : index
    %c0_107 = arith.constant 0 : index
    %113 = vector.load %arg6[%c2_105, %c0_106, %c0_107] : memref<10x10x80xf32, #tpu.memory_space<vmem>>, vector<8x8x80xf32>
    %114 = vector.shape_cast %113 : vector<8x8x80xf32> to vector<64x80xf32>
    %c2_108 = arith.constant 2 : index
    %c1_109 = arith.constant 1 : index
    %c0_110 = arith.constant 0 : index
    %115 = vector.load %arg6[%c2_108, %c1_109, %c0_110] : memref<10x10x80xf32, #tpu.memory_space<vmem>>, vector<8x8x80xf32>
    %116 = vector.shape_cast %115 : vector<8x8x80xf32> to vector<64x80xf32>
    %c2_111 = arith.constant 2 : index
    %c2_112 = arith.constant 2 : index
    %c0_113 = arith.constant 0 : index
    %117 = vector.load %arg6[%c2_111, %c2_112, %c0_113] : memref<10x10x80xf32, #tpu.memory_space<vmem>>, vector<8x8x80xf32>
    %118 = vector.shape_cast %117 : vector<8x8x80xf32> to vector<64x80xf32>
    %119 = tpu.concatenate %102, %104, %106, %108, %110, %112, %114, %116, %118 in 1 : vector<64x80xf32>, vector<64x80xf32>, vector<64x80xf32>, vector<64x80xf32>, vector<64x80xf32>, vector<64x80xf32>, vector<64x80xf32>, vector<64x80xf32>, vector<64x80xf32> -> vector<64x720xf32>
    %cst_114 = arith.constant dense<0.000000e+00> : vector<64x64xf32>
    %120 = tpu.matmul %119, %100, %cst_114 {dimension_numbers = #tpu.dot_dimension_numbers<[1], [0], [0], [1], [0, 0, 1, 1], [], []>} : vector<64x720xf32>, vector<720x64xf32>, vector<64x64xf32> -> vector<64x64xf32>
    %cst_115 = arith.constant dense<0.000000e+00> : vector<64xf32>
    %121 = vector.multi_reduction <add>, %120, %cst_115 [0] : vector<64x64xf32> to vector<64xf32>
    %122 = vector.shape_cast %121 : vector<64xf32> to vector<1x64xf32>
    %123 = vector.extract_strided_slice %122 {offsets = [0, 0], sizes = [1, 8], strides = [1, 1]} : vector<1x64xf32> to vector<1x8xf32>
    %124 = vector.extract_strided_slice %122 {offsets = [0, 8], sizes = [1, 8], strides = [1, 1]} : vector<1x64xf32> to vector<1x8xf32>
    %125 = arith.addf %123, %124 : vector<1x8xf32>
    %126 = vector.extract_strided_slice %122 {offsets = [0, 16], sizes = [1, 8], strides = [1, 1]} : vector<1x64xf32> to vector<1x8xf32>
    %127 = arith.addf %125, %126 : vector<1x8xf32>
    %128 = vector.extract_strided_slice %122 {offsets = [0, 24], sizes = [1, 8], strides = [1, 1]} : vector<1x64xf32> to vector<1x8xf32>
    %129 = arith.addf %127, %128 : vector<1x8xf32>
    %130 = vector.extract_strided_slice %122 {offsets = [0, 32], sizes = [1, 8], strides = [1, 1]} : vector<1x64xf32> to vector<1x8xf32>
    %131 = arith.addf %129, %130 : vector<1x8xf32>
    %132 = vector.extract_strided_slice %122 {offsets = [0, 40], sizes = [1, 8], strides = [1, 1]} : vector<1x64xf32> to vector<1x8xf32>
    %133 = arith.addf %131, %132 : vector<1x8xf32>
    %134 = vector.extract_strided_slice %122 {offsets = [0, 48], sizes = [1, 8], strides = [1, 1]} : vector<1x64xf32> to vector<1x8xf32>
    %135 = arith.addf %133, %134 : vector<1x8xf32>
    %136 = vector.extract_strided_slice %122 {offsets = [0, 56], sizes = [1, 8], strides = [1, 1]} : vector<1x64xf32> to vector<1x8xf32>
    %137 = arith.addf %135, %136 : vector<1x8xf32>
    %cst_116 = arith.constant 0.001953125 : f32
    %138 = vector.broadcast %cst_116 : f32 to vector<1x8xf32>
    %139 = arith.mulf %137, %138 : vector<1x8xf32>
    %140 = tpu.concatenate %139, %139, %139, %139, %139, %139, %139, %139 in 1 : vector<1x8xf32>, vector<1x8xf32>, vector<1x8xf32>, vector<1x8xf32>, vector<1x8xf32>, vector<1x8xf32>, vector<1x8xf32>, vector<1x8xf32> -> vector<1x64xf32>
    %141 = vector.broadcast %140 : vector<1x64xf32> to vector<64x64xf32>
    %142 = arith.subf %120, %141 : vector<64x64xf32>
    %143 = arith.mulf %142, %142 : vector<64x64xf32>
    %cst_117 = arith.constant dense<0.000000e+00> : vector<64xf32>
    %144 = vector.multi_reduction <add>, %143, %cst_117 [0] : vector<64x64xf32> to vector<64xf32>
    %145 = vector.shape_cast %144 : vector<64xf32> to vector<1x64xf32>
    %146 = vector.extract_strided_slice %145 {offsets = [0, 0], sizes = [1, 8], strides = [1, 1]} : vector<1x64xf32> to vector<1x8xf32>
    %147 = vector.extract_strided_slice %145 {offsets = [0, 8], sizes = [1, 8], strides = [1, 1]} : vector<1x64xf32> to vector<1x8xf32>
    %148 = arith.addf %146, %147 : vector<1x8xf32>
    %149 = vector.extract_strided_slice %145 {offsets = [0, 16], sizes = [1, 8], strides = [1, 1]} : vector<1x64xf32> to vector<1x8xf32>
    %150 = arith.addf %148, %149 : vector<1x8xf32>
    %151 = vector.extract_strided_slice %145 {offsets = [0, 24], sizes = [1, 8], strides = [1, 1]} : vector<1x64xf32> to vector<1x8xf32>
    %152 = arith.addf %150, %151 : vector<1x8xf32>
    %153 = vector.extract_strided_slice %145 {offsets = [0, 32], sizes = [1, 8], strides = [1, 1]} : vector<1x64xf32> to vector<1x8xf32>
    %154 = arith.addf %152, %153 : vector<1x8xf32>
    %155 = vector.extract_strided_slice %145 {offsets = [0, 40], sizes = [1, 8], strides = [1, 1]} : vector<1x64xf32> to vector<1x8xf32>
    %156 = arith.addf %154, %155 : vector<1x8xf32>
    %157 = vector.extract_strided_slice %145 {offsets = [0, 48], sizes = [1, 8], strides = [1, 1]} : vector<1x64xf32> to vector<1x8xf32>
    %158 = arith.addf %156, %157 : vector<1x8xf32>
    %159 = vector.extract_strided_slice %145 {offsets = [0, 56], sizes = [1, 8], strides = [1, 1]} : vector<1x64xf32> to vector<1x8xf32>
    %160 = arith.addf %158, %159 : vector<1x8xf32>
    %cst_118 = arith.constant 0.001953125 : f32
    %161 = vector.broadcast %cst_118 : f32 to vector<1x8xf32>
    %162 = arith.mulf %160, %161 : vector<1x8xf32>
    %cst_119 = arith.constant 9.99999974E-6 : f32
    %163 = vector.broadcast %cst_119 : f32 to vector<1x8xf32>
    %164 = arith.addf %162, %163 : vector<1x8xf32>
    %165 = math.rsqrt %164 : vector<1x8xf32>
    %166 = tpu.concatenate %165, %165, %165, %165, %165, %165, %165, %165 in 1 : vector<1x8xf32>, vector<1x8xf32>, vector<1x8xf32>, vector<1x8xf32>, vector<1x8xf32>, vector<1x8xf32>, vector<1x8xf32>, vector<1x8xf32> -> vector<1x64xf32>
    %167 = vector.broadcast %166 : vector<1x64xf32> to vector<64x64xf32>
    %168 = arith.mulf %142, %167 : vector<64x64xf32>
    %cst_120 = arith.constant 0.000000e+00 : f32
    %169 = vector.broadcast %cst_120 : f32 to vector<64x64xf32>
    %170 = arith.maximumf %168, %169 : vector<64x64xf32>
    %c0_121 = arith.constant 0 : index
    %c0_122 = arith.constant 0 : index
    %c0_123 = arith.constant 0 : index
    %171 = vector.load %arg4[%c0_121, %c0_122, %c0_123] : memref<1x64x64xf32, #tpu.memory_space<vmem>>, vector<1x64x64xf32>
    %172 = vector.shape_cast %171 : vector<1x64x64xf32> to vector<64x64xf32>
    %173 = vector.shape_cast %170 : vector<64x64xf32> to vector<1x64x64xf32>
    tpu.vector_store %arg4[%c0_121, %c0_122, %c0_123], %173 {strides = array<i32>} : memref<1x64x64xf32, #tpu.memory_space<vmem>>, vector<1x64x64xf32>,
    return
  }
  func.func @transform_0(%arg0: i32) -> (i32, i32, i32, i32) {
    %c0_i32 = arith.constant 0 : i32
    %c0_i32_0 = arith.constant 0 : i32
    %c0_i32_1 = arith.constant 0 : i32
    %c0_i32_2 = arith.constant 0 : i32
    return %arg0, %c0_i32, %c0_i32_0, %c0_i32_1 : i32, i32, i32, i32
  }
  func.func @transform_1(%arg0: i32) -> (i32, i32) {
    %c0_i32 = arith.constant 0 : i32
    %c0_i32_0 = arith.constant 0 : i32
    %c0_i32_1 = arith.constant 0 : i32
    return %c0_i32, %c0_i32_0 : i32, i32
  }
  func.func @transform_2(%arg0: i32) -> (i32, i32) {
    %c0_i32 = arith.constant 0 : i32
    %c0_i32_0 = arith.constant 0 : i32
    %c0_i32_1 = arith.constant 0 : i32
    return %c0_i32, %c0_i32_0 : i32, i32
  }
  func.func @transform_3(%arg0: i32) -> (i32, i32, i32) {
    %c0_i32 = arith.constant 0 : i32
    %c0_i32_0 = arith.constant 0 : i32
    %c0_i32_1 = arith.constant 0 : i32
    return %arg0, %c0_i32, %c0_i32_0 : i32, i32, i32
  }
}

</mosaic_0001>

<bundles_post_ra>
// kernel: double_conv.1
= control target key start
LH: loop header
LB: loop body
LE: loop exit
PB: predicated region body
PF: predicated region fallthrough
CT: control target
= control target key end

     0   :  { %s3055_s12 = smov 0   ;;  %s4555_s0 = inlined_call_operand.vmem [shape: f32[2,8,8,32], index: 0, kind: input, shape index: {}]   ;;  %s4556_s1 = inlined_call_operand.vmem [shape: f32[360,64], index: 1, kind: input, shape index: {}]   ;;  %s4557_s2 = inlined_call_operand.vmem [shape: f32[720,64], index: 2, kind: input, shape index: {}]   ;;  %s4558_s3 = inlined_call_operand.vmem [shape: f32[2,64,64], index: 3, kind: output, shape index: {}]  }
   0x1 LB: > { %s2339_s13 = sadd.s32 4294967295, %s3015_s12   ;;  %p2343_p0 = scmp.ge.s32.totalorder %s3015_s12, 1  ;;  %s3015_s12 = sphi %s3055_s12, %s13_s12  }
   0x2   : > { %p137_p1 = scmp.lt.s32.totalorder %s3015_s12, 3 }
   0x4   : > { %p138_p2 = pnand %p2343_p0, %p137_p1 }
   0x5   : > { %p3063_p3 = scmp.lt.s32.totalorder (!%p138_p2), %s2339_s13, 1  ;;  %vm186_vm0 = vcmask (!%p138_p2), 319488   ;;  %vm207_vm1 = vcmask (!%p138_p2), 31744   ;;  %vm209_vm2 = vcmask (!%p138_p2), 25600   ;;  %v3017_v0 = vmov (!%p138_p2), 0.0   ;;  %s3018_s19 = smov (!%p138_p2), 4  }
   0x6   : > { %141 = sbr.rel (%p138_p2) target bundleno = 2282 (0x8ea), region = 32  ;;  %188 = vst.msk [vmem:[#allocation2 + $0x10] sm:$0x1] (!%p138_p2), %vm186_vm0, %v3017_v0  ;;  %198 = vst.msk [vmem:[#allocation2 + $0x19] sm:$0x1] (!%p138_p2), %vm186_vm0, %v3017_v0  ;;  %vm229_vm3 = vcmask (!%p138_p2), 326944  }
   0x7   : > { %vm231_vm4 = vcmask (!%p138_p2), 320800   ;;  %189 = vst.msk [vmem:[#allocation2 + $0x20] sm:$0x1] (!%p138_p2), %vm186_vm0, %v3017_v0  ;;  %190 = vst.msk [vmem:[#allocation2 + $0x30] sm:$0x1] (!%p138_p2), %vm186_vm0, %v3017_v0  ;;  %vm179_vm5 = vcmask (!%p138_p2), 326656  }
   0x8   : > { %191 = vst.msk [vmem:[#allocation2 + $0x40] sm:$0x1] (!%p138_p2), %vm186_vm0, %v3017_v0  ;;  %192 = vst.msk [vmem:[#allocation2 + $0x50] sm:$0x1] (!%p138_p2), %vm186_vm0, %v3017_v0  ;;  %vm181_vm6 = vcmask (!%p138_p2), 320512   ;;  %s3019_s20 = smov (!%p138_p2), 112  }
   0x9   : > { %193 = vst.msk [vmem:[#allocation2 + $0x60] sm:$0x1] (!%p138_p2), %vm186_vm0, %v3017_v0  ;;  %194 = vst.msk [vmem:[#allocation2 + $0x70] sm:$0x1] (!%p138_p2), %vm186_vm0, %v3017_v0  ;;  %s3020_s21 = smov (!%p138_p2), 24   ;;  %v309_v11 = vld [vmem:[%s4556_s1 + $0x80] sm:$0xff] (!%p138_p2) }
   0xa   : > { %195 = vst.msk [vmem:[#allocation2 + $0x80] sm:$0x1] (!%p138_p2), %vm186_vm0, %v3017_v0  ;;  %199 = vst.msk [vmem:[#allocation2 + $0x29] sm:$0x1] (!%p138_p2), %vm186_vm0, %v3017_v0  ;;  %v310_v12 = vld [vmem:[%s4556_s1 + $0x88] sm:$0xff] (!%p138_p2)  ;;  %v293_v13 = vld [vmem:[%s4556_s1] sm:$0xff] (!%p138_p2) }
   0xb   : > { %200 = vst.msk [vmem:[#allocation2 + $0x39] sm:$0x1] (!%p138_p2), %vm186_vm0, %v3017_v0  ;;  %201 = vst.msk [vmem:[#allocation2 + $0x49] sm:$0x1] (!%p138_p2), %vm186_vm0, %v3017_v0  ;;  %v2595_v14 = vpack.c.bf16 (!%p138_p2), %v310_v12, %v309_v11  ;;  %v294_v15 = vld [vmem:[%s4556_s1 + $0x8] sm:$0xff] (!%p138_p2)  ;;  %v311_v16 = vld [vmem:[%s4556_s1 + $0x90] sm:$0xff] (!%p138_p2) }
   0xc   : > { %202 = vst.msk [vmem:[#allocation2 + $0x59] sm:$0x1] (!%p138_p2), %vm186_vm0, %v3017_v0  ;;  %203 = vst.msk [vmem:[#allocation2 + $0x69] sm:$0x1] (!%p138_p2), %vm186_vm0, %v3017_v0  ;;  %v312_v17 = vld [vmem:[%s4556_s1 + $0x98] sm:$0xff] (!%p138_p2)  ;;  %v2597_v18 = vpack.c.bf16 (!%p138_p2), %v294_v15, %v293_v13  ;;  %v295_v20 = vld [vmem:[%s4556_s1 + $0x10] sm:$0xff] (!%p138_p2) }
   0xd   : > { %204 = vst.msk [vmem:[#allocation2 + $0x79] sm:$0x1] %vm186_vm0, %v3017_v0  ;;  %205 = vst.msk [vmem:[#allocation2 + $0x89] sm:$0x1] %vm186_vm0, %v3017_v0  ;;  %s4566_s13 = smov (!%p3063_p3, %s2339_s13), 1  ;;  %v2599_v19 = vpack.c.bf16 %v312_v17, %v311_v16  ;;  %v296_v21 = vld [vmem:[%s4556_s1 + $0x18] sm:$0xff]  ;;  %2596 = vmatprep.subr.bf16.mxu0 %v2595_v14 }
   0xe   : > { %211 = vst.msk [vmem:[#allocation2 + $0x10] sm:$0xff] %vm207_vm1, %v3017_v0  ;;  %215 = vst.msk [vmem:[#allocation2 + $0x30] sm:$0xff] %vm207_vm1, %v3017_v0  ;;  %s4559_s15 = sshll.u32 %s4566_s13, 6  ;;  %v313_v22 = vld [vmem:[%s4556_s1 + $0xa0] sm:$0xff]  ;;  %v314_v23 = vld [vmem:[%s4556_s1 + $0xa8] sm:$0xff]  ;;  %2598 = vmatpush3.bf16.msra.mxu0 %v2597_v18  ;;  %v2601_v24 = vpack.c.bf16 %v296_v21, %v295_v20  ;;  %vm284_vm7 = vcmask 293920  }
   0xf   : > { %212 = vst.msk [vmem:[#allocation2 + $0x18] sm:$0x3] %vm209_vm2, %v3017_v0  ;;  %216 = vst.msk [vmem:[#allocation2 + $0x38] sm:$0x3] %vm209_vm2, %v3017_v0  ;;  %s165_s18 = scalar_lea.vmem %s4555_s0, %s4559_s15  ;;  %2600 = vmatprep.subr.bf16.mxu0 %v2599_v19  ;;  %v2603_v25 = vpack.c.bf16 %v314_v23, %v313_v22  ;;  %v297_v26 = vld [vmem:[%s4556_s1 + $0x20] sm:$0xff]  ;;  %v298_v27 = vld [vmem:[%s4556_s1 + $0x28] sm:$0xff] }
  0x10   : > { %213 = vst.msk [vmem:[#allocation2 + $0x20] sm:$0xff] %vm207_vm1, %v3017_v0  ;;  %217 = vst.msk [vmem:[#allocation2 + $0x40] sm:$0xff] %vm207_vm1, %v3017_v0  ;;  %v171_v1 = vld [vmem:[%s165_s18] sm:$0xff]  ;;  %v173_v2 = vld [vmem:[%s165_s18 + $0x10] sm:$0xff]  ;;  %v2605_v30 = vpack.c.bf16 %v298_v27, %v297_v26  ;;  %vm675_vm8 = vcmask 654336   ;;  %s3023_s22 = smov 72  }
  0x11   : > { %214 = vst.msk [vmem:[#allocation2 + $0x28] sm:$0x3] %vm209_vm2, %v3017_v0  ;;  %218 = vst.msk [vmem:[#allocation2 + $0x48] sm:$0x3] %vm209_vm2, %v3017_v0  ;;  %259 = vrot.lane.b32.xlu0 %v171_v1, %s3018_s19  ;;  %263 = vrot.lane.b32.xlu1 %v173_v2, %s3018_s19  ;;  %v172_v3 = vld [vmem:[%s165_s18 + $0x8] sm:$0xff]  ;;  %v174_v4 = vld [vmem:[%s165_s18 + $0x18] sm:$0xff] }
  0x12   : > { %219 = vst.msk [vmem:[#allocation2 + $0x50] sm:$0xff] %vm207_vm1, %v3017_v0  ;;  %221 = vst.msk [vmem:[#allocation2 + $0x60] sm:$0xff] %vm207_vm1, %v3017_v0  ;;  %v175_v5 = vld [vmem:[%s165_s18 + $0x20] sm:$0xff]  ;;  %v176_v6 = vld [vmem:[%s165_s18 + $0x28] sm:$0xff]  ;;  %2602 = vmatpush3.bf16.msra.mxu0 %v2601_v24  ;;  %s3024_s23 = smov 40   ;;  %s3025_s24 = smov 80  }
  0x13   : > { %220 = vst.msk [vmem:[#allocation2 + $0x58] sm:$0x3] %vm209_vm2, %v3017_v0  ;;  %222 = vst.msk [vmem:[#allocation2 + $0x68] sm:$0x3] %vm209_vm2, %v3017_v0  ;;  %v177_v7 = vld [vmem:[%s165_s18 + $0x30] sm:$0xff]  ;;  %v178_v8 = vld [vmem:[%s165_s18 + $0x38] sm:$0xff]  ;;  %2604 = vmatprep.subr.bf16.mxu0 %v2603_v25 }
  0x14   : > { %223 = vst.msk [vmem:[#allocation2 + $0x70] sm:$0xff] %vm207_vm1, %v3017_v0  ;;  %225 = vst.msk [vmem:[#allocation2 + $0x80] sm:$0xff] %vm207_vm1, %v3017_v0  ;;  %v315_v28 = vld [vmem:[%s4556_s1 + $0xb0] sm:$0xff]  ;;  %v316_v29 = vld [vmem:[%s4556_s1 + $0xb8] sm:$0xff]  ;;  %s3021_s18 = smov 32   ;;  %s3026_s29 = smov 64  }
  0x15   : > { %224 = vst.msk [vmem:[#allocation2 + $0x78] sm:$0x3] %vm209_vm2, %v3017_v0  ;;  %226 = vst.msk [vmem:[#allocation2 + $0x88] sm:$0x3] %vm209_vm2, %v3017_v0  ;;  %261 = vrot.lane.b32.xlu0 %v172_v3, %s3018_s19  ;;  %265 = vrot.lane.b32.xlu1 %v174_v4, %s3018_s19  ;;  %v2607_v31 = vpack.c.bf16 %v316_v29, %v315_v28  ;;  %v299_v32 = vld [vmem:[%s4556_s1 + $0x30] sm:$0xff]  ;;  %v300_v33 = vld [vmem:[%s4556_s1 + $0x38] sm:$0xff] }
  0x16   : > { %184 = vst.msk [vmem:[#allocation2 + $0x90] sm:$0xff] %vm179_vm5, %v3017_v0  ;;  %180 = vst.msk [vmem:[#allocation2] sm:$0xff] %vm179_vm5, %v3017_v0  ;;  %v317_v34 = vld [vmem:[%s4556_s1 + $0xc0] sm:$0xff]  ;;  %v318_v35 = vld [vmem:[%s4556_s1 + $0xc8] sm:$0xff]  ;;  %2606 = vmatpush3.bf16.msra.mxu0 %v2605_v30  ;;  %v2609_v36 = vpack.c.bf16 %v300_v33, %v299_v32  ;;  %vm693_vm9 = vcmask 261120   ;;  %vm702_vm10 = vcmask 588800  }
  0x17   : > { %233 = vst.msk [vmem:[#allocation2 + $0x10] sm:$0xff] %vm229_vm3, %v3017_v0  ;;  %237 = vst.msk [vmem:[#allocation2 + $0x30] sm:$0xff] %vm229_vm3, %v3017_v0  ;;  %2608 = vmatprep.subr.bf16.mxu0 %v2607_v31  ;;  %v2611_v37 = vpack.c.bf16 %v318_v35, %v317_v34  ;;  %v301_v38 = vld [vmem:[%s4556_s1 + $0x40] sm:$0xff]  ;;  %v302_v39 = vld [vmem:[%s4556_s1 + $0x48] sm:$0xff]  ;;  %vm711_vm11 = vcmask 916480   ;;  %vm684_vm12 = vcmask 982016  }
  0x18   : > { %234 = vst.msk [vmem:[#allocation2 + $0x18] sm:$0x3] %vm231_vm4, %v3017_v0  ;;  %238 = vst.msk [vmem:[#allocation2 + $0x38] sm:$0x3] %vm231_vm4, %v3017_v0  ;;  %v2613_v40 = vpack.c.bf16 %v302_v39, %v301_v38  ;;  %v319_v43 = vld [vmem:[%s4556_s1 + $0xd0] sm:$0xff]  ;;  %v320_v44 = vld [vmem:[%s4556_s1 + $0xd8] sm:$0xff] }
  0x19   : > { %235 = vst.msk [vmem:[#allocation2 + $0x20] sm:$0xff] %vm229_vm3, %v3017_v0  ;;  %239 = vst.msk [vmem:[#allocation2 + $0x40] sm:$0xff] %vm229_vm3, %v3017_v0  ;;  %267 = vrot.lane.b32.xlu0 %v175_v5, %s3018_s19  ;;  %269 = vrot.lane.b32.xlu1 %v176_v6, %s3018_s19  ;;  %v2615_v45 = vpack.c.bf16 %v320_v44, %v319_v43  ;;  %v303_v46 = vld [vmem:[%s4556_s1 + $0x50] sm:$0xff]  ;;  %v304_v47 = vld [vmem:[%s4556_s1 + $0x58] sm:$0xff]  ;;  %vm720_vm13 = vcmask 195584   ;;  %vm729_vm14 = vcmask 523264  }
  0x1a   : > { %236 = vst.msk [vmem:[#allocation2 + $0x28] sm:$0x3] %vm231_vm4, %v3017_v0  ;;  %240 = vst.msk [vmem:[#allocation2 + $0x48] sm:$0x3] %vm231_vm4, %v3017_v0  ;;  %2610 = vmatpush3.bf16.msra.mxu0 %v2609_v36  ;;  %v2617_v48 = vpack.c.bf16 %v304_v47, %v303_v46  ;;  %v321_v51 = vld [vmem:[%s4556_s1 + $0xe0] sm:$0xff]  ;;  %v322_v52 = vld [vmem:[%s4556_s1 + $0xe8] sm:$0xff] }
  0x1b   : > { %241 = vst.msk [vmem:[#allocation2 + $0x50] sm:$0xff] %vm229_vm3, %v3017_v0  ;;  %243 = vst.msk [vmem:[#allocation2 + $0x60] sm:$0xff] %vm229_vm3, %v3017_v0  ;;  %2612 = vmatprep.subr.bf16.mxu0 %v2611_v37  ;;  %v2619_v53 = vpack.c.bf16 %v322_v52, %v321_v51  ;;  %v305_v54 = vld [vmem:[%s4556_s1 + $0x60] sm:$0xff]  ;;  %v306_v55 = vld [vmem:[%s4556_s1 + $0x68] sm:$0xff]  ;;  %vm738_vm15 = vcmask 850944   ;;  %s3027_s9 = smov 96  }
  0x1c   : > { %242 = vst.msk [vmem:[#allocation2 + $0x58] sm:$0x3] %vm231_vm4, %v3017_v0  ;;  %244 = vst.msk [vmem:[#allocation2 + $0x68] sm:$0x3] %vm231_vm4, %v3017_v0  ;;  %v2621_v56 = vpack.c.bf16 %v306_v55, %v305_v54  ;;  %v323_v59 = vld [vmem:[%s4556_s1 + $0xf0] sm:$0xff]  ;;  %v324_v60 = vld [vmem:[%s4556_s1 + $0xf8] sm:$0xff] }
  0x1d   : > { %245 = vst.msk [vmem:[#allocation2 + $0x70] sm:$0xff] %vm229_vm3, %v3017_v0  ;;  %247 = vst.msk [vmem:[#allocation2 + $0x80] sm:$0xff] %vm229_vm3, %v3017_v0  ;;  %271 = vrot.lane.b32.xlu0 %v177_v7, %s3018_s19  ;;  %273 = vrot.lane.b32.xlu1 %v178_v8, %s3018_s19  ;;  %v307_v61 = vld [vmem:[%s4556_s1 + $0x70] sm:$0xff]  ;;  %v2623_v63 = vpack.c.bf16 %v324_v60, %v323_v59  ;;  %v308_v1 = vld [vmem:[%s4556_s1 + $0x78] sm:$0xff]  ;;  %s3022_s19 = smov 120   ;;  %s3028_s10 = smov 104  }
  0x1e   : > { %246 = vst.msk [vmem:[#allocation2 + $0x78] sm:$0x3] %vm231_vm4, %v3017_v0  ;;  %248 = vst.msk [vmem:[#allocation2 + $0x88] sm:$0x3] %vm231_vm4, %v3017_v0  ;;  %2614 = vmatpush3.bf16.msra.mxu0 %v2613_v40  ;;  %v2625_v7 = vpack.c.bf16 %v308_v1, %v307_v61  ;;  %v325_v31 = vld [vmem:[%s4556_s1 + $0x100] sm:$0xff]  ;;  %v326_v32 = vld [vmem:[%s4556_s1 + $0x108] sm:$0xff] }
  0x1f   : > { %196 = vst.msk [vmem:[#allocation2 + $0x90] sm:$0x1] %vm186_vm0, %v3017_v0  ;;  %187 = vst.msk [vmem:[#allocation2] sm:$0x1] %vm186_vm0, %v3017_v0  ;;  %2616 = vmatprep.subr.bf16.mxu0 %v2615_v45  ;;  %v3359_v33 = vpack.c.bf16 %v326_v32, %v325_v31  ;;  %v330_v31 = vld [vmem:[%s4556_s1 + $0x128] sm:$0xff]  ;;  %s3029_s11 = smov 88  }
  0x20   : > { %182 = vst.msk [vmem:[#allocation2 + $0x8] sm:$0x3] %vm181_vm6, %v3017_v0  ;;  %185 = vst.msk [vmem:[#allocation2 + $0x98] sm:$0x3] %vm181_vm6, %v3017_v0  ;;  %s3030_s14 = smov 16   ;;  %s3031_s16 = smov 8  }
  0x21   : > { %227 = vst.msk [vmem:[#allocation2 + $0x90] sm:$0xff] %vm207_vm1, %v3017_v0  ;;  %208 = vst.msk [vmem:[#allocation2] sm:$0xff] %vm207_vm1, %v3017_v0  ;;  %s3032_s17 = smov 48   ;;  %s4560_s25 = smov 56   ;;  %vm1048_vm1 = vcmask 130048   ;;  %vm1207_vm6 = vcmask 58368  }
  0x22   : > { %206 = vst.msk [vmem:[#allocation2 + $0x99] sm:$0x1] %vm186_vm0, %v3017_v0  ;;  %197 = vst.msk [vmem:[#allocation2 + $0x9] sm:$0x1] %vm186_vm0, %v3017_v0  ;;  %2618 = vmatpush3.bf16.msra.mxu0 %v2617_v48  ;;  %vm1046_vm0 = vcmask 64512   ;;  %s4563_s8 = smov 56  }
  0x23   : > { %249 = vst.msk [vmem:[#allocation2 + $0x90] sm:$0xff] %vm229_vm3, %v3017_v0  ;;  %230 = vst.msk [vmem:[#allocation2] sm:$0xff] %vm229_vm3, %v3017_v0  ;;  %2620 = vmatprep.subr.bf16.mxu0 %v2619_v53  ;;  %vm1055_vm3 = vcmask 457728  }
  0x24   : > { %228 = vst.msk [vmem:[#allocation2 + $0x98] sm:$0x3] %vm209_vm2, %v3017_v0  ;;  %210 = vst.msk [vmem:[#allocation2 + $0x8] sm:$0x3] %vm209_vm2, %v3017_v0  ;;  %vm1053_vm2 = vcmask 392192  }
  0x25   : > { %250 = vst.msk [vmem:[#allocation2 + $0x98] sm:$0x3] %vm231_vm4, %v3017_v0  ;;  %232 = vst.msk [vmem:[#allocation2 + $0x8] sm:$0x3] %vm231_vm4, %v3017_v0  ;;  %vm1185_vm4 = vcmask 647168  }
  0x26   : > { %2622 = vmatpush3.bf16.msra.mxu0 %v2621_v56  ;;  %1179 = vst.msk [vmem:[#allocation3] sm:$0xff] %vm675_vm8, %v3017_v0  ;;  %1183 = vst.msk [vmem:[#allocation3 + $0x90] sm:$0xff] %vm675_vm8, %v3017_v0 }
  0x27   : > { %2624 = vmatprep.subr.bf16.mxu0 %v2623_v63  ;;  %1188 = vst.msk [vmem:[#allocation3 + $0x20] sm:$0x1] %vm1185_vm4, %v3017_v0  ;;  %1198 = vst.msk [vmem:[#allocation3 + $0x29] sm:$0x1] %vm1185_vm4, %v3017_v0 }
  0x28   : > { %1186 = vst.msk [vmem:[#allocation3] sm:$0x1] %vm1185_vm4, %v3017_v0  ;;  %1187 = vst.msk [vmem:[#allocation3 + $0x10] sm:$0x1] %vm1185_vm4, %v3017_v0 }
  0x29   : > { %1189 = vst.msk [vmem:[#allocation3 + $0x30] sm:$0x1] %vm1185_vm4, %v3017_v0  ;;  %1190 = vst.msk [vmem:[#allocation3 + $0x40] sm:$0x1] %vm1185_vm4, %v3017_v0 }
  0x2a   : > { %v394_v9 = vld [vmem:[#allocation2 + $0x90] sm:$0xff]  ;;  %2626 = vmatpush3.bf16.msra.mxu0 %v2625_v7  ;;  %v338_v7 = vld [vmem:[#allocation2] sm:$0xff]  ;;  %1191 = vst.msk [vmem:[#allocation3 + $0x50] sm:$0x1] %vm1185_vm4, %v3017_v0  ;;  %1192 = vst.msk [vmem:[#allocation3 + $0x60] sm:$0x1] %vm1185_vm4, %v3017_v0 }
  0x2b   : > { %593 = vrot.lane.b32.xlu1 %v394_v9, %s3019_s20  ;;  %2628 = vmatprep.subr.bf16.mxu0 %v3359_v33  ;;  %1193 = vst.msk [vmem:[#allocation3 + $0x70] sm:$0x1] %vm1185_vm4, %v3017_v0  ;;  %1194 = vst.msk [vmem:[#allocation3 + $0x80] sm:$0x1] %vm1185_vm4, %v3017_v0 }
  0x2c   : > { %v402_v10 = vld [vmem:[#allocation2 + $0x91] sm:$0xff]  ;;  %v346_v11 = vld [vmem:[#allocation2 + $0x1] sm:$0xff]  ;;  %1195 = vst.msk [vmem:[#allocation3 + $0x90] sm:$0x1] %vm1185_vm4, %v3017_v0  ;;  %1197 = vst.msk [vmem:[#allocation3 + $0x19] sm:$0x1] %vm1185_vm4, %v3017_v0 }
  0x2d   : > { %v354_v15 = vld [vmem:[#allocation2 + $0x2] sm:$0xff]  ;;  %v410_v53 = vld [vmem:[#allocation2 + $0x92] sm:$0xff]  ;;  %1199 = vst.msk [vmem:[#allocation3 + $0x39] sm:$0x1] %vm1185_vm4, %v3017_v0  ;;  %1200 = vst.msk [vmem:[#allocation3 + $0x49] sm:$0x1] %vm1185_vm4, %v3017_v0 }
  0x2e   : > { %1201 = vst.msk [vmem:[#allocation3 + $0x59] sm:$0x1] %vm1185_vm4, %v3017_v0  ;;  %1202 = vst.msk [vmem:[#allocation3 + $0x69] sm:$0x1] %vm1185_vm4, %v3017_v0 }
  0x2f   : > { %625 = vrot.lane.b32.xlu1 %v402_v10, %s3020_s21  ;;  %1203 = vst.msk [vmem:[#allocation3 + $0x79] sm:$0x1] %vm1185_vm4, %v3017_v0  ;;  %1204 = vst.msk [vmem:[#allocation3 + $0x89] sm:$0x1] %vm1185_vm4, %v3017_v0 }
  0x30   : > { %1211 = vst.msk [vmem:[#allocation3 + $0x20] sm:$0xff] %vm1046_vm0, %v3017_v0  ;;  %1209 = vst.msk [vmem:[#allocation3 + $0x10] sm:$0xff] %vm1046_vm0, %v3017_v0 }
  0x31   : > { %1212 = vst.msk [vmem:[#allocation3 + $0x28] sm:$0x3] %vm1207_vm6, %v3017_v0  ;;  %1210 = vst.msk [vmem:[#allocation3 + $0x18] sm:$0x3] %vm1207_vm6, %v3017_v0 }
  0x32   : > { %1206 = vst.msk [vmem:[#allocation3] sm:$0xff] %vm1046_vm0, %v3017_v0  ;;  %1213 = vst.msk [vmem:[#allocation3 + $0x30] sm:$0xff] %vm1046_vm0, %v3017_v0 }
  0x33   : > { %1214 = vst.msk [vmem:[#allocation3 + $0x38] sm:$0x3] %vm1207_vm6, %v3017_v0  ;;  %1216 = vst.msk [vmem:[#allocation3 + $0x48] sm:$0x3] %vm1207_vm6, %v3017_v0 }
  0x34   : > { %1215 = vst.msk [vmem:[#allocation3 + $0x40] sm:$0xff] %vm1046_vm0, %v3017_v0  ;;  %1217 = vst.msk [vmem:[#allocation3 + $0x50] sm:$0xff] %vm1046_vm0, %v3017_v0 }
  0x35   : > { %1218 = vst.msk [vmem:[#allocation3 + $0x58] sm:$0x3] %vm1207_vm6, %v3017_v0  ;;  %1220 = vst.msk [vmem:[#allocation3 + $0x68] sm:$0x3] %vm1207_vm6, %v3017_v0 }
  0x36   : > { %1219 = vst.msk [vmem:[#allocation3 + $0x60] sm:$0xff] %vm1046_vm0, %v3017_v0  ;;  %1221 = vst.msk [vmem:[#allocation3 + $0x70] sm:$0xff] %vm1046_vm0, %v3017_v0 }
  0x37   : > { %1222 = vst.msk [vmem:[#allocation3 + $0x78] sm:$0x3] %vm1207_vm6, %v3017_v0  ;;  %1224 = vst.msk [vmem:[#allocation3 + $0x88] sm:$0x3] %vm1207_vm6, %v3017_v0 }
  0x38   : > { %1223 = vst.msk [vmem:[#allocation3 + $0x80] sm:$0xff] %vm1046_vm0, %v3017_v0  ;;  %1225 = vst.msk [vmem:[#allocation3 + $0x90] sm:$0xff] %vm1046_vm0, %v3017_v0 }
  0x83   : > { %v260_v41 = vpop.permute.xlu0 %259  ;;  %v264_v42 = vpop.permute.xlu1 %263 }
  0x84   : > { %285 = vst.msk [vmem:[#allocation2 + $0x11] sm:$0xff] %vm284_vm7, %v260_v41  ;;  %287 = vst.msk [vmem:[#allocation2 + $0x31] sm:$0xff] %vm284_vm7, %v264_v42 }
  0x87   : > { %v262_v49 = vpop.permute.xlu0 %261  ;;  %v266_v50 = vpop.permute.xlu1 %265 }
  0x88   : > { %286 = vst.msk [vmem:[#allocation2 + $0x21] sm:$0xff] %vm284_vm7, %v262_v49  ;;  %288 = vst.msk [vmem:[#allocation2 + $0x41] sm:$0xff] %vm284_vm7, %v266_v50 }
  0x8b   : > { %v268_v57 = vpop.permute.xlu0 %267  ;;  %v270_v58 = vpop.permute.xlu1 %269  ;;  %v370_v62 = vld [vmem:[#allocation2 + $0x11] sm:$0xff] }
  0x8c   : > { %289 = vst.msk [vmem:[#allocation2 + $0x51] sm:$0xff] %vm284_vm7, %v268_v57  ;;  %290 = vst.msk [vmem:[#allocation2 + $0x61] sm:$0xff] %vm284_vm7, %v270_v58  ;;  %v3311_v3 = vld [vmem:[#allocation2 + $0x10] sm:$0xff]  ;;  %v2790_v14 = vpack.i.bf16 %v370_v62, %v346_v11 }
  0x8d   : > { %v378_v12 = vld [vmem:[#allocation2 + $0x12] sm:$0xff] }
  0x8e   : > { %v3331_v16 = vld [vmem:[#allocation2 + $0x30] sm:$0xff]  ;;  %v2800_v18 = vpack.i.bf16 %v378_v12, %v354_v15 }
  0x8f   : > { %v3309_v2 = vld [vmem:[#allocation2 + $0x21] sm:$0xff]  ;;  %v272_v5 = vpop.permute.xlu0 %271  ;;  %v274_v6 = vpop.permute.xlu1 %273  ;;  %v372_v20 = vld [vmem:[#allocation2 + $0x31] sm:$0xff] }
  0x90   : > { %v3313_v4 = vld [vmem:[#allocation2 + $0x20] sm:$0xff]  ;;  %v2785_v8 = vpack.i.bf16 %v3309_v2, %v370_v62  ;;  %291 = vst.msk [vmem:[#allocation2 + $0x71] sm:$0xff] %vm284_vm7, %v272_v5  ;;  %292 = vst.msk [vmem:[#allocation2 + $0x81] sm:$0xff] %vm284_vm7, %v274_v6  ;;  %v2815_v23 = vpack.i.bf16 %v372_v20, %v3309_v2  ;;  %v380_v24 = vld [vmem:[#allocation2 + $0x32] sm:$0xff]  ;;  %vm1227_vm7 = vcmask 654912  }
  0x91   : > { %v2780_v9 = vpack.i.bf16 %v3313_v4, %v3311_v3  ;;  %v3324_v10 = vld [vmem:[#allocation2 + $0x22] sm:$0xff]  ;;  %1233 = vst.msk [vmem:[#allocation3 + $0x20] sm:$0xff] %vm1227_vm7, %v3017_v0  ;;  %1231 = vst.msk [vmem:[#allocation3 + $0x10] sm:$0xff] %vm1227_vm7, %v3017_v0 }
  0x92   : > { %2786 = vrot.lane.b32.xlu1 %v2785_v8, %s3021_s18  ;;  %v2795_v13 = vpack.i.bf16 %v3324_v10, %v378_v12  ;;  %v3333_v17 = vld [vmem:[#allocation2 + $0x40] sm:$0xff]  ;;  %v2825_v27 = vpack.i.bf16 %v380_v24, %v3324_v10  ;;  %v327_v12 = vld [vmem:[%s4556_s1 + $0x110] sm:$0xff]  ;;  %1237 = vst.msk [vmem:[#allocation3 + $0x40] sm:$0xff] %vm1227_vm7, %v3017_v0  ;;  %1228 = vst.msk [vmem:[#allocation3] sm:$0xff] %vm1227_vm7, %v3017_v0 }
  0x93   : > { %2781 = vrot.lane.b32.xlu0 %v2780_v9, %s3022_s19  ;;  %v2805_v19 = vpack.i.bf16 %v3333_v17, %v3331_v16  ;;  %v373_v21 = vld [vmem:[#allocation2 + $0x41] sm:$0xff]  ;;  %v3349_v28 = vld [vmem:[#allocation2 + $0x50] sm:$0xff]  ;;  %1235 = vst.msk [vmem:[#allocation3 + $0x30] sm:$0xff] %vm1227_vm7, %v3017_v0  ;;  %1239 = vst.msk [vmem:[#allocation3 + $0x50] sm:$0xff] %vm1227_vm7, %v3017_v0 }
  0x94   : > { %v2810_v22 = vpack.i.bf16 %v373_v21, %v372_v20  ;;  %v381_v25 = vld [vmem:[#allocation2 + $0x42] sm:$0xff]  ;;  %v374_v34 = vld [vmem:[#allocation2 + $0x51] sm:$0xff]  ;;  %1241 = vst.msk [vmem:[#allocation3 + $0x60] sm:$0xff] %vm1227_vm7, %v3017_v0  ;;  %1243 = vst.msk [vmem:[#allocation3 + $0x70] sm:$0xff] %vm1227_vm7, %v3017_v0 }
  0x95   : > { %v2820_v26 = vpack.i.bf16 %v381_v25, %v380_v24  ;;  %v375_v29 = vld [vmem:[#allocation2 + $0x61] sm:$0xff]  ;;  %v382_v38 = vld [vmem:[#allocation2 + $0x52] sm:$0xff]  ;;  %v2840_v40 = vpack.i.bf16 %v374_v34, %v373_v21  ;;  %1245 = vst.msk [vmem:[#allocation3 + $0x80] sm:$0xff] %vm1227_vm7, %v3017_v0  ;;  %1247 = vst.msk [vmem:[#allocation3 + $0x90] sm:$0xff] %vm1227_vm7, %v3017_v0 }
  0x96   : > { %2796 = vrot.lane.b32.xlu1 %v2795_v13, %s3023_s22  ;;  %v3351_v30 = vld [vmem:[#allocation2 + $0x60] sm:$0xff]  ;;  %v2835_v35 = vpack.i.bf16 %v375_v29, %v374_v34  ;;  %v2850_v43 = vpack.i.bf16 %v382_v38, %v381_v25  ;;  %v328_v13 = vld [vmem:[%s4556_s1 + $0x118] sm:$0xff] }
  0x97   : > { %2791 = vrot.lane.b32.xlu0 %v2790_v14, %s3024_s23  ;;  %v2830_v36 = vpack.i.bf16 %v3351_v30, %v3349_v28  ;;  %v383_v37 = vld [vmem:[#allocation2 + $0x62] sm:$0xff]  ;;  %v3372_v41 = vld [vmem:[#allocation2 + $0x70] sm:$0xff] }
  0x98   : > { %v2845_v39 = vpack.i.bf16 %v383_v37, %v382_v38  ;;  %v369_v42 = vld [vmem:[#allocation2 + $0x80] sm:$0xff]  ;;  %v376_v45 = vld [vmem:[#allocation2 + $0x71] sm:$0xff] }
  0x99   : > { %v2855_v44 = vpack.i.bf16 %v369_v42, %v3372_v41  ;;  %v377_v46 = vld [vmem:[#allocation2 + $0x81] sm:$0xff]  ;;  %v2865_v48 = vpack.i.bf16 %v376_v45, %v375_v29  ;;  %v384_v49 = vld [vmem:[#allocation2 + $0x72] sm:$0xff] }
  0x9a   : > { %579 = vrot.lane.b32.xlu1 %v3313_v4, %s3019_s20  ;;  %v2860_v47 = vpack.i.bf16 %v377_v46, %v376_v45  ;;  %v385_v50 = vld [vmem:[#allocation2 + $0x82] sm:$0xff]  ;;  %v2875_v52 = vpack.i.bf16 %v384_v49, %v383_v37 }
  0x9b   : > { %2801 = vrot.lane.b32.xlu0 %v2800_v18, %s3025_s24  ;;  %v2870_v51 = vpack.i.bf16 %v385_v50, %v384_v49 }
  0x9d   : > { %v3403_v54 = vpop.permute.xlu1 %593 }
  0x9e   : > { %2806 = vrot.lane.b32.xlu1 %v2805_v19, %s3022_s19 }
  0x9f   : > { %581 = vrot.lane.b32.xlu0 %v3331_v16, %s3019_s20 }
  0xa1   : > { %v3405_v55 = vpop.permute.xlu1 %625 }
  0xa2   : > { %2816 = vrot.lane.b32.xlu1 %v2815_v23, %s3024_s23 }
  0xa3   : > { %2811 = vrot.lane.b32.xlu0 %v2810_v22, %s3021_s18  ;;  %v2631_v22 = vpack.c.bf16 %v328_v13, %v327_v12 }
  0xa6   : > { %2826 = vrot.lane.b32.xlu1 %v2825_v27, %s3025_s24 }
  0xa7   : > { %2821 = vrot.lane.b32.xlu0 %v2820_v26, %s3023_s22 }
  0xaa   : > { %585 = vrot.lane.b32.xlu1 %v3349_v28, %s3019_s20 }
  0xab   : > { %583 = vrot.lane.b32.xlu0 %v3333_v17, %s3019_s20 }
  0xae   : > { %2836 = vrot.lane.b32.xlu1 %v2835_v35, %s3021_s18 }
  0xaf   : > { %2831 = vrot.lane.b32.xlu0 %v2830_v36, %s3022_s19 }
  0xb2   : > { %2846 = vrot.lane.b32.xlu1 %v2845_v39, %s3023_s22  ;;  %v332_v39 = vld [vmem:[%s4556_s1 + $0x138] sm:$0xff] }
  0xb3   : > { %2841 = vrot.lane.b32.xlu0 %v2840_v40, %s3024_s23 }
  0xb6   : > { %587 = vrot.lane.b32.xlu1 %v3351_v30, %s3019_s20 }
  0xb7   : > { %2851 = vrot.lane.b32.xlu0 %v2850_v43, %s3025_s24 }
  0xba   : > { %2856 = vrot.lane.b32.xlu1 %v2855_v44, %s3022_s19  ;;  %v333_v44 = vld [vmem:[%s4556_s1 + $0x140] sm:$0xff] }
  0xbb   : > { %589 = vrot.lane.b32.xlu0 %v3372_v41, %s3019_s20 }
  0xbe   : > { %2866 = vrot.lane.b32.xlu1 %v2865_v48, %s3024_s23 }
  0xbf   : > { %2861 = vrot.lane.b32.xlu0 %v2860_v47, %s3021_s18 }
  0xc2   : > { %2876 = vrot.lane.b32.xlu1 %v2875_v52, %s3025_s24 }
  0xc3   : > { %2871 = vrot.lane.b32.xlu0 %v2870_v51, %s3023_s22 }
  0xc6   : > { %613 = vrot.lane.b32.xlu1 %v372_v20, %s3020_s21 }
  0xc7   : > { %591 = vrot.lane.b32.xlu0 %v369_v42, %s3019_s20 }
  0xca   : > { %645 = vrot.lane.b32.xlu1 %v380_v24, %s3026_s29 }
  0xcb   : > { %611 = vrot.lane.b32.xlu0 %v3309_v2, %s3020_s21 }
  0xce   : > { %617 = vrot.lane.b32.xlu1 %v374_v34, %s3020_s21 }
  0xcf   : > { %643 = vrot.lane.b32.xlu0 %v3324_v10, %s3026_s29 }
  0xd2   : > { %649 = vrot.lane.b32.xlu1 %v382_v38, %s3026_s29  ;;  %v331_v38 = vld [vmem:[%s4556_s1 + $0x130] sm:$0xff] }
  0xd3   : > { %615 = vrot.lane.b32.xlu0 %v373_v21, %s3020_s21 }
  0xd6   : > { %621 = vrot.lane.b32.xlu1 %v376_v45, %s3020_s21  ;;  %v334_v45 = vld [vmem:[%s4556_s1 + $0x148] sm:$0xff] }
  0xd7   : > { %647 = vrot.lane.b32.xlu0 %v381_v25, %s3026_s29 }
  0xda   : > { %653 = vrot.lane.b32.xlu1 %v384_v49, %s3026_s29 }
  0xdb   : > { %619 = vrot.lane.b32.xlu0 %v375_v29, %s3020_s21  ;;  %v329_v29 = vld [vmem:[%s4556_s1 + $0x120] sm:$0xff] }
  0xdc   : > { %v2635_v35 = vpack.c.bf16 %v330_v31, %v329_v29 }
  0xde   : > { %657 = vrot.lane.b32.xlu1 %v410_v53, %s3026_s29 }
  0xdf   : > { %651 = vrot.lane.b32.xlu0 %v383_v37, %s3026_s29 }
  0xe3   : > { %623 = vrot.lane.b32.xlu0 %v377_v46, %s3020_s21 }
  0xe7   : > { %655 = vrot.lane.b32.xlu0 %v385_v50, %s3026_s29 }
 0x104   : > { %v2787_v56 = vpop.permute.xlu1 %2786 }
 0x105   : > { %v2782_v57 = vpop.permute.xlu0 %2781  ;;  %v2788_v58 = vunpack.i.l.bf16 %v2787_v56  ;;  %v2789_v2 = vunpack.i.h.bf16 %v2787_v56 }
 0x106   : > { %v2783_v59 = vunpack.i.l.bf16 %v2782_v57  ;;  %v2784_v5 = vunpack.i.h.bf16 %v2782_v57 }
 0x108   : > { %v2797_v60 = vpop.permute.xlu1 %2796  ;;  %v694_v1 = vsel %vm693_vm9, %v2783_v59, %v2788_v58  ;;  %v695_v21 = vsel %vm693_vm9, %v2784_v5, %v2789_v2  ;;  %v2643_v58 = vpack.c.bf16 %v334_v45, %v333_v44 }
 0x109   : > { %v2792_v61 = vpop.permute.xlu0 %2791  ;;  %v2798_v62 = vunpack.i.l.bf16 %v2797_v60  ;;  %v2799_v8 = vunpack.i.h.bf16 %v2797_v60 }
 0x10a   : > { %v2793_v63 = vunpack.i.l.bf16 %v2792_v61  ;;  %v2794_v9 = vunpack.i.h.bf16 %v2792_v61 }
 0x10b   : > { %v703_v6 = vsel %vm702_vm10, %v694_v1, %v2798_v62  ;;  %v704_v26 = vsel %vm702_vm10, %v695_v21, %v2799_v8  ;;  %v337_v21 = vld [vmem:[%s4556_s1 + $0x160] sm:$0xff] }
 0x10c   : > { %v3409_v10 = vpop.permute.xlu1 %579  ;;  %v667_v19 = vsel %vm179_vm5, %v338_v7, %v2793_v63  ;;  %v668_v27 = vsel %vm179_vm5, %v3311_v3, %v2794_v9 }
 0x10d   : > { %v2802_v11 = vpop.permute.xlu0 %2801  ;;  %v712_v18 = vsel %vm711_vm11, %v703_v6, %v3409_v10 }
 0x10e   : > { %v2804_v14 = vunpack.i.h.bf16 %v2802_v11  ;;  %v2803_v15 = vunpack.i.l.bf16 %v2802_v11  ;;  %827 = vmatprep.mubr.f32.mxu0 %v712_v18 }
 0x110   : > { %v676_v20 = vsel %vm675_vm8, %v667_v19, %v2803_v15  ;;  %v3422_v23 = vpop.permute.xlu1 %2806  ;;  %v677_v34 = vsel %vm675_vm8, %v668_v27, %v2804_v14 }
 0x111   : > { %v3424_v24 = vpop.permute.xlu0 %581  ;;  %v685_v25 = vsel %vm684_vm12, %v676_v20, %v2783_v59  ;;  %v686_v37 = vsel %vm684_vm12, %v677_v34, %v2784_v5  ;;  %v2808_v46 = vunpack.i.l.bf16 %v3422_v23  ;;  %v2809_v49 = vunpack.i.h.bf16 %v3422_v23  ;;  %v336_v5 = vld [vmem:[%s4556_s1 + $0x158] sm:$0xff] }
 0x112   : > { %828 = vmatmul.mubr.f32.vlgmr.msra.gmra.mrb[0].mxu0 %v685_v25  ;;  %v713_v32 = vsel %vm711_vm11, %v704_v26, %v3424_v24 }
 0x113   : > { %832 = vmatprep.mubr.f32.mxu0 %v713_v32  ;;  %2630 = vmatpush3.bf16.msra.mxu0 %v3359_v33  ;;  %v2639_v33 = vpack.c.bf16 %v332_v39, %v331_v38 }
 0x114   : > { %2632 = vmatprep.subr.bf16.mxu0 %v2631_v22  ;;  %v2817_v3 = vpop.permute.xlu1 %2816 }
 0x115   : > { %v2812_v36 = vpop.permute.xlu0 %2811  ;;  %v2818_v40 = vunpack.i.l.bf16 %v2817_v3  ;;  %v2819_v53 = vunpack.i.h.bf16 %v2817_v3 }
 0x116   : > { %833 = vmatmul.mubr.f32.gmra.mrb[2].mxu0 %v686_v37  ;;  %v2813_v42 = vunpack.i.l.bf16 %v2812_v36  ;;  %v2814_v43 = vunpack.i.h.bf16 %v2812_v36 }
 0x117   : > { %2634 = vmatpush3.bf16.msra.mxu0 %v2631_v22  ;;  %v669_v57 = vsel %vm179_vm5, %v3313_v4, %v2818_v40  ;;  %v335_v4 = vld [vmem:[%s4556_s1 + $0x150] sm:$0xff]  ;;  %v670_v8 = vsel %vm179_vm5, %v3331_v16, %v2819_v53 }
 0x118   : > { %2636 = vmatprep.subr.bf16.mxu0 %v2635_v35  ;;  %v2827_v47 = vpop.permute.xlu1 %2826  ;;  %v696_v56 = vsel %vm693_vm9, %v2808_v46, %v2813_v42  ;;  %v697_v62 = vsel %vm693_vm9, %v2809_v49, %v2814_v43  ;;  %v2647_v12 = vpack.c.bf16 %v336_v5, %v335_v4 }
 0x119   : > { %v2822_v48 = vpop.permute.xlu0 %2821  ;;  %v2828_v50 = vunpack.i.l.bf16 %v2827_v47  ;;  %v2829_v59 = vunpack.i.h.bf16 %v2827_v47 }
 0x11a   : > { %v2824_v51 = vunpack.i.h.bf16 %v2822_v48  ;;  %v2823_v52 = vunpack.i.l.bf16 %v2822_v48 }
 0x11b   : > { %2638 = vmatpush3.bf16.msra.mxu0 %v2635_v35  ;;  %v678_v61 = vsel %vm675_vm8, %v669_v57, %v2828_v50  ;;  %v679_v11 = vsel %vm675_vm8, %v670_v8, %v2829_v59 }
 0x11c   : > { %v705_v60 = vsel %vm702_vm10, %v696_v56, %v2823_v52  ;;  %2640 = vmatprep.subr.bf16.mxu0 %v2639_v33  ;;  %v3461_v63 = vpop.permute.xlu1 %585  ;;  %v706_v2 = vsel %vm702_vm10, %v697_v62, %v2824_v51  ;;  %v687_v7 = vsel %vm684_vm12, %v678_v61, %v2808_v46  ;;  %v688_v19 = vsel %vm684_vm12, %v679_v11, %v2809_v49 }
 0x11d   : > { %v3463_v1 = vpop.permute.xlu0 %583  ;;  %v715_v9 = vsel %vm711_vm11, %v706_v2, %v3461_v63 }
 0x11e   : > { %v714_v6 = vsel %vm711_vm11, %v705_v60, %v3463_v1 }
 0x11f   : > { %837 = vmatprep.mubr.f32.mxu0 %v714_v6  ;;  %2642 = vmatpush3.bf16.msra.mxu0 %v2639_v33 }
 0x120   : > { %838 = vmatmul.mubr.f32.gmra.mrb[4].mxu0 %v687_v7  ;;  %2644 = vmatprep.subr.bf16.mxu0 %v2643_v58  ;;  %v2837_v13 = vpop.permute.xlu1 %2836 }
 0x121   : > { %v2832_v14 = vpop.permute.xlu0 %2831  ;;  %842 = vmatprep.mubr.f32.mxu0 %v715_v9  ;;  %v2838_v15 = vunpack.i.l.bf16 %v2837_v13  ;;  %v2839_v26 = vunpack.i.h.bf16 %v2837_v13 }
 0x122   : > { %v2833_v18 = vunpack.i.l.bf16 %v2832_v14  ;;  %v2834_v27 = vunpack.i.h.bf16 %v2832_v14 }
 0x123   : > { %2646 = vmatpush3.bf16.msra.mxu0 %v2643_v58 }
 0x124   : > { %843 = vmatmul.mubr.f32.gmra.mrb[6].mxu0 %v688_v19  ;;  %2648 = vmatprep.subr.bf16.mxu0 %v2647_v12  ;;  %v2847_v16 = vpop.permute.xlu1 %2846  ;;  %v698_v25 = vsel %vm693_vm9, %v2833_v18, %v2838_v15  ;;  %v699_v40 = vsel %vm693_vm9, %v2834_v27, %v2839_v26 }
 0x125   : > { %v2842_v20 = vpop.permute.xlu0 %2841  ;;  %v2848_v22 = vunpack.i.l.bf16 %v2847_v16  ;;  %v2849_v31 = vunpack.i.h.bf16 %v2847_v16 }
 0x126   : > { %v2843_v23 = vunpack.i.l.bf16 %v2842_v20  ;;  %v2844_v32 = vunpack.i.h.bf16 %v2842_v20 }
 0x127   : > { %2650 = vmatpush3.bf16.msra.mxu0 %v2647_v12  ;;  %v707_v29 = vsel %vm702_vm10, %v698_v25, %v2848_v22  ;;  %v708_v44 = vsel %vm702_vm10, %v699_v40, %v2849_v31 }
 0x128   : > { %2581 = vmatprep.subr.mxu0 %v337_v21  ;;  %v3486_v34 = vpop.permute.xlu1 %587  ;;  %v671_v38 = vsel %vm179_vm5, %v3333_v17, %v2843_v23  ;;  %v672_v45 = vsel %vm179_vm5, %v3349_v28, %v2844_v32 }
 0x129   : > { %v2852_v35 = vpop.permute.xlu0 %2851  ;;  %v716_v37 = vsel %vm711_vm11, %v707_v29, %v3486_v34 }
 0x12a   : > { %v2854_v3 = vunpack.i.h.bf16 %v2852_v35  ;;  %v2853_v36 = vunpack.i.l.bf16 %v2852_v35  ;;  %847 = vmatprep.mubr.f32.mxu0 %v716_v37 }
 0x12b   : > { %2582 = vmatpush3.msra.mxu0 %v337_v21 }
 0x12c   : > { %v680_v39 = vsel %vm675_vm8, %v671_v38, %v2853_v36  ;;  %v2857_v42 = vpop.permute.xlu1 %2856  ;;  %v681_v17 = vsel %vm675_vm8, %v672_v45, %v2854_v3 }
 0x12d   : > { %v3494_v43 = vpop.permute.xlu0 %589  ;;  %v689_v33 = vsel %vm684_vm12, %v680_v39, %v2833_v18  ;;  %v690_v49 = vsel %vm684_vm12, %v681_v17, %v2834_v27  ;;  %v2858_v53 = vunpack.i.l.bf16 %v2857_v42  ;;  %v2859_v58 = vunpack.i.h.bf16 %v2857_v42 }
 0x12e   : > { %848 = vmatmul.mubr.f32.gmra.mrb[8].mxu0 %v689_v33  ;;  %v717_v46 = vsel %vm711_vm11, %v708_v44, %v3494_v43 }
 0x12f   : > { %852 = vmatprep.mubr.f32.mxu0 %v717_v46 }
 0x130   : > { %v2867_v47 = vpop.permute.xlu1 %2866 }
 0x131   : > { %v2862_v48 = vpop.permute.xlu0 %2861  ;;  %v2868_v50 = vunpack.i.l.bf16 %v2867_v47  ;;  %v2869_v61 = vunpack.i.h.bf16 %v2867_v47 }
 0x132   : > { %853 = vmatmul.mubr.f32.gmra.mrb[10].mxu0 %v690_v49  ;;  %v2863_v51 = vunpack.i.l.bf16 %v2862_v48  ;;  %v2864_v52 = vunpack.i.h.bf16 %v2862_v48 }
 0x133   : > { %v673_v2 = vsel %vm179_vm5, %v3351_v30, %v2868_v50  ;;  %v674_v14 = vsel %vm179_vm5, %v3372_v41, %v2869_v61 }
 0x134   : > { %v2877_v56 = vpop.permute.xlu1 %2876  ;;  %v700_v62 = vsel %vm693_vm9, %v2858_v53, %v2863_v51  ;;  %v701_v7 = vsel %vm693_vm9, %v2859_v58, %v2864_v52 }
 0x135   : > { %v2872_v57 = vpop.permute.xlu0 %2871  ;;  %v2878_v28 = vunpack.i.l.bf16 %v2877_v56  ;;  %v2879_v4 = vunpack.i.h.bf16 %v2877_v56 }
 0x136   : > { %v2874_v59 = vunpack.i.h.bf16 %v2872_v57  ;;  %v2873_v60 = vunpack.i.l.bf16 %v2872_v57 }
 0x137   : > { %v682_v6 = vsel %vm675_vm8, %v673_v2, %v2878_v28  ;;  %v683_v15 = vsel %vm675_vm8, %v674_v14, %v2879_v4 }
 0x138   : > { %v709_v5 = vsel %vm702_vm10, %v700_v62, %v2873_v60  ;;  %v614_v8 = vpop.permute.xlu1 %613  ;;  %v710_v11 = vsel %vm702_vm10, %v701_v7, %v2874_v59  ;;  %v691_v13 = vsel %vm684_vm12, %v682_v6, %v2858_v53  ;;  %v692_v16 = vsel %vm684_vm12, %v683_v15, %v2859_v58 }
 0x139   : > { %v592_v9 = vpop.permute.xlu0 %591  ;;  %v719_v30 = vsel %vm711_vm11, %v710_v11, %v3403_v54  ;;  %v722_v22 = vsel %vm720_vm13, %v3424_v24, %v614_v8  ;;  %vm1229_vm10 = vcmask 648768   ;;  %vm1180_vm12 = vcmask 648192  }
 0x13a   : > { %v718_v12 = vsel %vm711_vm11, %v709_v5, %v592_v9  ;;  %1234 = vst.msk [vmem:[#allocation3 + $0x28] sm:$0x3] %vm1229_vm10, %v3017_v0  ;;  %1232 = vst.msk [vmem:[#allocation3 + $0x18] sm:$0x3] %vm1229_vm10, %v3017_v0 }
 0x13b   : > { %857 = vmatprep.mubr.f32.mxu0 %v718_v12  ;;  %1238 = vst.msk [vmem:[#allocation3 + $0x48] sm:$0x3] %vm1229_vm10, %v3017_v0  ;;  %1236 = vst.msk [vmem:[#allocation3 + $0x38] sm:$0x3] %vm1229_vm10, %v3017_v0 }
 0x13c   : > { %858 = vmatmul.mubr.f32.gmra.mrb[12].mxu0 %v691_v13  ;;  %v646_v18 = vpop.permute.xlu1 %645  ;;  %1240 = vst.msk [vmem:[#allocation3 + $0x58] sm:$0x3] %vm1229_vm10, %v3017_v0  ;;  %1242 = vst.msk [vmem:[#allocation3 + $0x68] sm:$0x3] %vm1229_vm10, %v3017_v0 }
 0x13d   : > { %v612_v19 = vpop.permute.xlu0 %611  ;;  %862 = vmatprep.mubr.f32.mxu0 %v719_v30  ;;  %v731_v25 = vsel %vm729_vm14, %v722_v22, %v646_v18  ;;  %1244 = vst.msk [vmem:[#allocation3 + $0x78] sm:$0x3] %vm1229_vm10, %v3017_v0  ;;  %1246 = vst.msk [vmem:[#allocation3 + $0x88] sm:$0x3] %vm1229_vm10, %v3017_v0 }
 0x13e   : > { %v721_v20 = vsel %vm720_vm13, %v3409_v10, %v612_v19  ;;  %1181 = vst.msk [vmem:[#allocation3 + $0x8] sm:$0x3] %vm1180_vm12, %v3017_v0  ;;  %1184 = vst.msk [vmem:[#allocation3 + $0x98] sm:$0x3] %vm1180_vm12, %v3017_v0 }
 0x13f   : > { %1196 = vst.msk [vmem:[#allocation3 + $0x9] sm:$0x1] %vm1185_vm4, %v3017_v0  ;;  %1205 = vst.msk [vmem:[#allocation3 + $0x99] sm:$0x1] %vm1185_vm4, %v3017_v0  ;;  %vm1718_vm4 = vcmask 785408  }
 0x140   : > { %863 = vmatmul.mubr.f32.gmra.mrb[14].mxu0 %v692_v16  ;;  %v618_v21 = vpop.permute.xlu1 %617  ;;  %1208 = vst.msk [vmem:[#allocation3 + $0x8] sm:$0x3] %vm1207_vm6, %v3017_v0  ;;  %1226 = vst.msk [vmem:[#allocation3 + $0x98] sm:$0x3] %vm1207_vm6, %v3017_v0 }
 0x141   : > { %v644_v41 = vpop.permute.xlu0 %643  ;;  %v724_v10 = vsel %vm720_vm13, %v3461_v63, %v618_v21  ;;  %1230 = vst.msk [vmem:[#allocation3 + $0x8] sm:$0x3] %vm1229_vm10, %v3017_v0  ;;  %1248 = vst.msk [vmem:[#allocation3 + $0x98] sm:$0x3] %vm1229_vm10, %v3017_v0 }
 0x142   : > { %v730_v23 = vsel %vm729_vm14, %v721_v20, %v644_v41 }
 0x143   : > { %2583 = vmatprep.mubr.msk.f32.mxu0 %vm738_vm15, %v730_v23 }
 0x144   : > { %2584 = vmatmul.mubr.msk.f32.vlgmr.msra.gmra.mrb[16].mxu0 %vm738_vm15, %v731_v25  ;;  %v650_v26 = vpop.permute.xlu1 %649 }
 0x145   : > { %v616_v27 = vpop.permute.xlu0 %615  ;;  %v733_v35 = vsel %vm729_vm14, %v724_v10, %v650_v26 }
 0x146   : > { %v723_v29 = vsel %vm720_vm13, %v3463_v1, %v616_v27 }
 0x148   : > { %v622_v32 = vpop.permute.xlu1 %621 }
 0x149   : > { %v648_v31 = vpop.permute.xlu0 %647  ;;  %v726_v1 = vsel %vm720_vm13, %v3494_v43, %v622_v32 }
 0x14a   : > { %v732_v24 = vsel %vm729_vm14, %v723_v29, %v648_v31 }
 0x14b   : > { %2586 = vmatprep.mubr.msk.f32.mxu0 %vm738_vm15, %v732_v24 }
 0x14c   : > { %2587 = vmatmul.mubr.msk.f32.gmra.mrb[18].mxu0 %vm738_vm15, %v733_v35  ;;  %v654_v36 = vpop.permute.xlu1 %653 }
 0x14d   : > { %v620_v3 = vpop.permute.xlu0 %619  ;;  %v735_v39 = vsel %vm729_vm14, %v726_v1, %v654_v36 }
 0x14e   : > { %v725_v37 = vsel %vm720_vm13, %v3486_v34, %v620_v3  ;;  %v728_v34 = vsel %vm720_vm13, %v3403_v54, %v3405_v55 }
 0x150   : > { %v658_v42 = vpop.permute.xlu1 %657 }
 0x151   : > { %v652_v38 = vpop.permute.xlu0 %651  ;;  %v737_v43 = vsel %vm729_vm14, %v728_v34, %v658_v42 }
 0x152   : > { %v734_v63 = vsel %vm729_vm14, %v725_v37, %v652_v38 }
 0x153   : > { %2589 = vmatprep.mubr.msk.f32.mxu0 %vm738_vm15, %v734_v63 }
 0x154   : > { %2590 = vmatmul.mubr.msk.f32.gmra.mrb[20].mxu0 %vm738_vm15, %v735_v39 }
 0x155   : > { %v624_v40 = vpop.permute.xlu0 %623 }
 0x156   : > { %v727_v33 = vsel %vm720_vm13, %v592_v9, %v624_v40 }
 0x159   : > { %v656_v44 = vpop.permute.xlu0 %655 }
 0x15a   : > { %v736_v45 = vsel %vm729_vm14, %v727_v33, %v656_v44 }
 0x15b   : > { %2592 = vmatprep.mubr.msk.f32.mxu0 %vm738_vm15, %v736_v45 }
 0x15c   : > { %2593 = vmatmul.mubr.msk.f32.gmra.mrb[22].mxu0 %vm738_vm15, %v737_v43  ;;  %vm1282_vm15 = vcmask 588864  }
 0x1e5   : > { %v2400_v46 = vpop.f32.mrb[0].mxu0 }
 0x1e6   : > { %v2401_v17 = vpop.f32.mrb[1].mxu0 }
 0x1e7   : > { %v2402_v47 = vadd.f32 %v2401_v17, %v2400_v46 }
 0x1e9   : > { %v2403_v48 = vpop.f32.mrb[2].mxu0 }
 0x1ea   : > { %v2404_v49 = vpop.f32.mrb[3].mxu0 }
 0x1eb   : > { %v2405_v50 = vadd.f32 %v2404_v49, %v2403_v48 }
 0x1f3   : > { %v2406_v51 = vpop.f32.mrb[4].mxu0 }
 0x1f4   : > { %v2407_v52 = vpop.f32.mrb[5].mxu0 }
 0x1f5   : > { %v2408_v53 = vadd.f32 %v2407_v52, %v2406_v51 }
 0x1f7   : > { %v2409_v56 = vpop.f32.mrb[6].mxu0 }
 0x1f8   : > { %v2410_v57 = vpop.f32.mrb[7].mxu0 }
 0x1f9   : > { %v2411_v54 = vadd.f32 %v2410_v57, %v2409_v56 }
 0x201   : > { %v2412_v55 = vpop.f32.mrb[8].mxu0 }
 0x202   : > { %v2413_v58 = vpop.f32.mrb[9].mxu0 }
 0x203   : > { %v2414_v28 = vadd.f32 %v2413_v58, %v2412_v55 }
 0x205   : > { %v2415_v59 = vpop.f32.mrb[10].mxu0 }
 0x206   : > { %v2416_v60 = vpop.f32.mrb[11].mxu0 }
 0x207   : > { %v2417_v61 = vadd.f32 %v2416_v60, %v2415_v59  ;;  %v1057_v60 = vlaneseq }
 0x20f   : > { %v2418_v62 = vpop.f32.mrb[12].mxu0 }
 0x210   : > { %v2419_v2 = vpop.f32.mrb[13].mxu0 }
 0x211   : > { %v2420_v4 = vadd.f32 %v2419_v2, %v2418_v62 }
 0x213   : > { %v2421_v5 = vpop.f32.mrb[14].mxu0 }
 0x214   : > { %v2422_v6 = vpop.f32.mrb[15].mxu0 }
 0x215   : > { %v2423_v7 = vadd.f32 %v2422_v6, %v2421_v5  ;;  %v1058_v5 = vshrl.u32 %v1057_v60, 7 }
 0x217   : > { %v2585_v8 = vpop.f32.mrb[16].mxu0 }
 0x218   : > { %v3551_v9 = vadd.f32 %v2585_v8, %v2405_v50  ;;  %v934_v11 = vpop.f32.mrb[17].mxu0 }
 0x219   : > { %v3553_v12 = vadd.f32 %v2402_v47, %v934_v11 }
 0x21a   : > { %v974_v18 = vsel %vm729_vm14, %v3551_v9, 0.0 }
 0x21b   : > { %v973_v19 = vsel %vm729_vm14, %v3553_v12, 0.0 }
 0x21c   : > { %v975_v20 = vadd.f32 %v974_v18, %v973_v19 }
 0x21f   : > { %v2588_v13 = vpop.f32.mrb[18].mxu0 }
 0x220   : > { %v3555_v14 = vadd.f32 %v2588_v13, %v2411_v54  ;;  %v944_v30 = vpop.f32.mrb[19].mxu0  ;;  %v3602_v13 = vsub.s32 0, %v1058_v5 }
 0x221   : > { %v3557_v15 = vadd.f32 %v2408_v53, %v944_v30 }
 0x222   : > { %v978_v26 = vsel %vm729_vm14, %v3555_v14, 0.0 }
 0x223   : > { %v976_v16 = vsel %vm729_vm14, %v3557_v15, 0.0 }
 0x224   : > { %v977_v41 = vadd.f32 %v976_v16, %v975_v20 }
 0x226   : > { %v979_v29 = vadd.f32 %v978_v26, %v977_v41 }
 0x227   : > { %v2591_v21 = vpop.f32.mrb[20].mxu0 }
 0x228   : > { %v3565_v22 = vadd.f32 %v2591_v21, %v2417_v61  ;;  %v954_v23 = vpop.f32.mrb[21].mxu0 }
 0x229   : > { %v3567_v25 = vadd.f32 %v2414_v28, %v954_v23 }
 0x22a   : > { %v982_v35 = vsel %vm729_vm14, %v3565_v22, 0.0 }
 0x22b   : > { %v980_v27 = vsel %vm729_vm14, %v3567_v25, 0.0 }
 0x22c   : > { %v981_v31 = vadd.f32 %v980_v27, %v979_v29 }
 0x22e   : > { %v983_v36 = vadd.f32 %v982_v35, %v981_v31 }
 0x22f   : > { %v2594_v10 = vpop.f32.mrb[22].mxu0 }
 0x230   : > { %v3573_v32 = vadd.f32 %v2594_v10, %v2423_v7  ;;  %v964_v24 = vpop.f32.mrb[23].mxu0 }
 0x231   : > { %v3577_v3 = vadd.f32 %v2420_v4, %v964_v24 }
 0x232   : > { %v986_v1 = vsel %vm729_vm14, %v3573_v32, 0.0 }
 0x233   : > { %v984_v37 = vsel %vm729_vm14, %v3577_v3, 0.0 }
 0x234   : > { %v985_v38 = vadd.f32 %v984_v37, %v983_v36 }
 0x236   : > { %v987_v63 = vadd.f32 %v986_v1, %v985_v38 }
 0x238   : > { %v988_v39 = vrot.slane %v987_v63, 4 }
 0x23a   : > { %v989_v40 = vadd.f32 %v988_v39, %v987_v63 }
 0x23c   : > { %v990_v42 = vrot.slane %v989_v40, 2 }
 0x23e   : > { %v991_v33 = vadd.f32 %v990_v42, %v989_v40 }
 0x240   : > { %v992_v44 = vrot.slane %v991_v33, 1 }
 0x242   : > { %v993_v34 = vadd.f32 %v992_v44, %v991_v33 }
 0x244   : > { %999 = vrot.lane.b32.xlu1 %v993_v34, %s3019_s20  ;;  %995 = vrot.lane.b32.xlu0 %v993_v34, %s3022_s19 }
 0x248   : > { %1007 = vrot.lane.b32.xlu1 %v993_v34, %s3027_s9  ;;  %1003 = vrot.lane.b32.xlu0 %v993_v34, %s3028_s10 }
 0x24c   : > { %1015 = vrot.lane.b32.xlu1 %v993_v34, %s3025_s24  ;;  %1011 = vrot.lane.b32.xlu0 %v993_v34, %s3029_s11 }
 0x250   : > { %1019 = vrot.lane.b32.xlu0 %v993_v34, %s3023_s22 }
 0x2b6   : > { %v1000_v45 = vpop.permute.xlu1 %999  ;;  %v996_v43 = vpop.permute.xlu0 %995 }
 0x2b7   : > { %v998_v46 = vadd.f32 %v996_v43, %v993_v34 }
 0x2b9   : > { %v1002_v17 = vadd.f32 %v1000_v45, %v998_v46 }
 0x2ba   : > { %v1008_v47 = vpop.permute.xlu1 %1007  ;;  %v1004_v48 = vpop.permute.xlu0 %1003 }
 0x2bb   : > { %v1006_v49 = vadd.f32 %v1004_v48, %v1002_v17 }
 0x2bd   : > { %v1010_v50 = vadd.f32 %v1008_v47, %v1006_v49 }
 0x2be   : > { %v1012_v51 = vpop.permute.xlu0 %1011  ;;  %v1016_v53 = vpop.permute.xlu1 %1015 }
 0x2bf   : > { %v1014_v52 = vadd.f32 %v1012_v51, %v1010_v50 }
 0x2c1   : > { %v1018_v56 = vadd.f32 %v1016_v53, %v1014_v52 }
 0x2c2   : > { %v1020_v57 = vpop.permute.xlu0 %1019 }
 0x2c3   : > { %v1022_v54 = vadd.f32 %v1020_v57, %v1018_v56 }
 0x2c5   : > { %v1023_v55 = vmul.f32 0.001953125, %v1022_v54 }
 0x2c7   : > { %1028 = vrot.lane.b32.xlu0 %v1023_v55, %s3030_s14  ;;  %1025 = vrot.lane.b32.xlu1 %v1023_v55, %s3031_s16 }
 0x2cb   : > { %1034 = vrot.lane.b32.xlu0 %v1023_v55, %s3021_s18  ;;  %1031 = vrot.lane.b32.xlu1 %v1023_v55, %s3020_s21 }
 0x2cf   : > { %1040 = vrot.lane.b32.xlu0 %v1023_v55, %s3032_s17  ;;  %1037 = vrot.lane.b32.xlu1 %v1023_v55, %s3024_s23 }
 0x2d3   : > { %1043 = vrot.lane.b32.xlu1 %v1023_v55, %s4560_s25 }
 0x339   : > { %v1029_v58 = vpop.permute.xlu0 %1028  ;;  %v1026_v28 = vpop.permute.xlu1 %1025 }
 0x33a   : > { %v1047_v59 = vsel %vm1046_vm0, %v1023_v55, %v1026_v28 }
 0x33b   : > { %v1049_v62 = vsel %vm1048_vm1, %v1047_v59, %v1029_v58 }
 0x33d   : > { %v1035_v61 = vpop.permute.xlu0 %1034  ;;  %v1032_v2 = vpop.permute.xlu1 %1031 }
 0x33e   : > { %v1050_v4 = vsel %vm720_vm13, %v1049_v62, %v1032_v2 }
 0x33f   : > { %v1051_v6 = vsel %vm693_vm9, %v1050_v4, %v1035_v61 }
 0x341   : > { %v1038_v7 = vpop.permute.xlu1 %1037  ;;  %v1041_v8 = vpop.permute.xlu0 %1040 }
 0x342   : > { %v1052_v11 = vsel %vm179_vm5, %v1051_v6, %v1038_v7 }
 0x343   : > { %v1054_v30 = vsel %vm1053_vm2, %v1052_v11, %v1041_v8 }
 0x345   : > { %v1044_v18 = vpop.permute.xlu1 %1043 }
 0x346   : > { %v1056_v19 = vsel %vm1055_vm3, %v1054_v30, %v1044_v18 }
 0x347   : > { %v1060_v16 = vrot.slane %v1056_v19, %v3602_v13 }
 0x349   : > { %v3608_v20 = vsub.f32 %v3553_v12, %v1060_v16  ;;  %v3611_v21 = vsub.f32 %v3551_v9, %v1060_v16  ;;  %v3614_v41 = vsub.f32 %v3557_v15, %v1060_v16  ;;  %v3617_v23 = vsub.f32 %v3555_v14, %v1060_v16 }
 0x34a   : > { %v3620_v26 = vsub.f32 %v3567_v25, %v1060_v16  ;;  %v3629_v9 = vsub.f32 %v3565_v22, %v1060_v16  ;;  %v3636_v10 = vsub.f32 %v3577_v3, %v1060_v16  ;;  %v3642_v22 = vsub.f32 %v3573_v32, %v1060_v16 }
 0x34b   : > { %v1069_v27 = vmul.f32 %v3608_v20, %v3608_v20  ;;  %v1070_v29 = vmul.f32 %v3611_v21, %v3611_v21  ;;  %v1071_v12 = vmul.f32 %v3614_v41, %v3614_v41  ;;  %v1072_v15 = vmul.f32 %v3617_v23, %v3617_v23 }
 0x34c   : > { %v1073_v24 = vmul.f32 %v3620_v26, %v3620_v26  ;;  %v1074_v37 = vmul.f32 %v3629_v9, %v3629_v9  ;;  %v1075_v63 = vmul.f32 %v3636_v10, %v3636_v10  ;;  %v1076_v40 = vmul.f32 %v3642_v22, %v3642_v22 }
 0x34d   : > { %v1077_v14 = vsel %vm729_vm14, %v1069_v27, 0.0  ;;  %v1078_v25 = vsel %vm729_vm14, %v1070_v29, 0.0  ;;  %v1080_v35 = vsel %vm729_vm14, %v1071_v12, 0.0  ;;  %v1082_v38 = vsel %vm729_vm14, %v1072_v15, 0.0 }
 0x34e   : > { %v1079_v31 = vadd.f32 %v1078_v25, %v1077_v14  ;;  %v1084_v3 = vsel %vm729_vm14, %v1073_v24, 0.0  ;;  %v1086_v42 = vsel %vm729_vm14, %v1074_v37, 0.0  ;;  %v1088_v32 = vsel %vm729_vm14, %v1075_v63, 0.0 }
 0x34f   : > { %v1090_v34 = vsel %vm729_vm14, %v1076_v40, 0.0 }
 0x350   : > { %v1081_v36 = vadd.f32 %v1080_v35, %v1079_v31 }
 0x352   : > { %v1083_v1 = vadd.f32 %v1082_v38, %v1081_v36 }
 0x354   : > { %v1085_v39 = vadd.f32 %v1084_v3, %v1083_v1 }
 0x356   : > { %v1087_v33 = vadd.f32 %v1086_v42, %v1085_v39 }
 0x358   : > { %v1089_v44 = vadd.f32 %v1088_v32, %v1087_v33  ;;  %v1292_v33 = vld [vmem:[%s4557_s2 + $0x8] sm:$0xff]  ;;  %v1309_v32 = vld [vmem:[%s4557_s2 + $0x90] sm:$0xff] }
 0x35a   : > { %v1091_v45 = vadd.f32 %v1090_v34, %v1089_v44  ;;  %v1310_v44 = vld [vmem:[%s4557_s2 + $0x98] sm:$0xff] }
 0x35c   : > { %v1092_v43 = vrot.slane %v1091_v45, 4 }
 0x35e   : > { %v1093_v46 = vadd.f32 %v1092_v43, %v1091_v45  ;;  %v2655_v45 = vpack.c.bf16 %v1310_v44, %v1309_v32  ;;  %v1293_v43 = vld [vmem:[%s4557_s2 + $0x10] sm:$0xff]  ;;  %v1389_v32 = vld [vmem:[#allocation3 + $0x1] sm:$0xff] }
 0x360   : > { %v1094_v17 = vrot.slane %v1093_v46, 2 }
 0x362   : > { %v1095_v47 = vadd.f32 %v1094_v17, %v1093_v46  ;;  %v1294_v46 = vld [vmem:[%s4557_s2 + $0x18] sm:$0xff]  ;;  %v1311_v17 = vld [vmem:[%s4557_s2 + $0xa0] sm:$0xff] }
 0x364   : > { %v1096_v48 = vrot.slane %v1095_v47, 1 }
 0x366   : > { %v1097_v49 = vadd.f32 %v1096_v48, %v1095_v47  ;;  %v1312_v47 = vld [vmem:[%s4557_s2 + $0xa8] sm:$0xff]  ;;  %v2657_v48 = vpack.c.bf16 %v1294_v46, %v1293_v43 }
 0x368   : > { %1103 = vrot.lane.b32.xlu1 %v1097_v49, %s3019_s20  ;;  %1099 = vrot.lane.b32.xlu0 %v1097_v49, %s3022_s19 }
 0x36c   : > { %1111 = vrot.lane.b32.xlu1 %v1097_v49, %s3027_s9  ;;  %1107 = vrot.lane.b32.xlu0 %v1097_v49, %s3028_s10 }
 0x370   : > { %1119 = vrot.lane.b32.xlu1 %v1097_v49, %s3025_s24  ;;  %1115 = vrot.lane.b32.xlu0 %v1097_v49, %s3029_s11 }
 0x374   : > { %1123 = vrot.lane.b32.xlu0 %v1097_v49, %s3023_s22 }
 0x3da   : > { %v1104_v50 = vpop.permute.xlu1 %1103  ;;  %v1100_v51 = vpop.permute.xlu0 %1099 }
 0x3db   : > { %v1102_v52 = vadd.f32 %v1100_v51, %v1097_v49  ;;  %v2659_v49 = vpack.c.bf16 %v1312_v47, %v1311_v17  ;;  %v1296_v51 = vld [vmem:[%s4557_s2 + $0x28] sm:$0xff] }
 0x3dd   : > { %v1106_v53 = vadd.f32 %v1104_v50, %v1102_v52  ;;  %v1295_v50 = vld [vmem:[%s4557_s2 + $0x20] sm:$0xff]  ;;  %v1313_v52 = vld [vmem:[%s4557_s2 + $0xb0] sm:$0xff] }
 0x3de   : > { %v1112_v56 = vpop.permute.xlu1 %1111  ;;  %v1108_v57 = vpop.permute.xlu0 %1107 }
 0x3df   : > { %v1110_v54 = vadd.f32 %v1108_v57, %v1106_v53  ;;  %v1314_v53 = vld [vmem:[%s4557_s2 + $0xb8] sm:$0xff] }
 0x3e0   : > { %v2663_v57 = vpack.c.bf16 %v1314_v53, %v1313_v52  ;;  %v1345_v53 = vld [vmem:[%s4557_s2 + $0x1b0] sm:$0xff] }
 0x3e1   : > { %v1114_v55 = vadd.f32 %v1112_v56, %v1110_v54  ;;  %v2661_v56 = vpack.c.bf16 %v1296_v51, %v1295_v50  ;;  %v1297_v54 = vld [vmem:[%s4557_s2 + $0x30] sm:$0xff] }
 0x3e2   : > { %v1116_v58 = vpop.permute.xlu0 %1115  ;;  %v1120_v59 = vpop.permute.xlu1 %1119 }
 0x3e3   : > { %v1118_v28 = vadd.f32 %v1116_v58, %v1114_v55  ;;  %v1298_v55 = vld [vmem:[%s4557_s2 + $0x38] sm:$0xff]  ;;  %v1315_v58 = vld [vmem:[%s4557_s2 + $0xc0] sm:$0xff] }
 0x3e5   : > { %v1122_v60 = vadd.f32 %v1120_v59, %v1118_v28  ;;  %v1316_v28 = vld [vmem:[%s4557_s2 + $0xc8] sm:$0xff]  ;;  %v2665_v59 = vpack.c.bf16 %v1298_v55, %v1297_v54 }
 0x3e6   : > { %v1124_v61 = vpop.permute.xlu0 %1123 }
 0x3e7   : > { %v1126_v62 = vadd.f32 %v1124_v61, %v1122_v60  ;;  %v2667_v60 = vpack.c.bf16 %v1316_v28, %v1315_v58  ;;  %v1299_v61 = vld [vmem:[%s4557_s2 + $0x40] sm:$0xff] }
 0x3e9   : > { %v1127_v2 = vmul.f32 0.001953125, %v1126_v62  ;;  %v1300_v62 = vld [vmem:[%s4557_s2 + $0x48] sm:$0xff] }
 0x3eb   : > { %v1128_v4 = vadd.f32 1e-05, %v1127_v2  ;;  %v1317_v2 = vld [vmem:[%s4557_s2 + $0xd0] sm:$0xff] }
 0x3ed   : > { %3005 = vrsqrt.f32 %v1128_v4  ;;  %v1318_v4 = vld [vmem:[%s4557_s2 + $0xd8] sm:$0xff] }
 0x3f7   : > { %v3662_v5 = vpop.eup %3005 }
 0x3f8   : > { %1134 = vrot.lane.b32.xlu0 %v3662_v5, %s3030_s14  ;;  %1131 = vrot.lane.b32.xlu1 %v3662_v5, %s3031_s16 }
 0x3fc   : > { %1140 = vrot.lane.b32.xlu0 %v3662_v5, %s3021_s18  ;;  %1137 = vrot.lane.b32.xlu1 %v3662_v5, %s3020_s21 }
 0x400   : > { %1146 = vrot.lane.b32.xlu0 %v3662_v5, %s3032_s17  ;;  %1143 = vrot.lane.b32.xlu1 %v3662_v5, %s3024_s23 }
 0x404   : > { %1149 = vrot.lane.b32.xlu1 %v3662_v5, %s4560_s25 }
 0x46a   : > { %v1135_v6 = vpop.permute.xlu0 %1134  ;;  %v1132_v7 = vpop.permute.xlu1 %1131 }
 0x46b   : > { %v1152_v8 = vsel %vm1046_vm0, %v3662_v5, %v1132_v7  ;;  %v2669_v5 = vpack.c.bf16 %v1300_v62, %v1299_v61  ;;  %v1301_v7 = vld [vmem:[%s4557_s2 + $0x50] sm:$0xff] }
 0x46c   : > { %v1153_v30 = vsel %vm1048_vm1, %v1152_v8, %v1135_v6  ;;  %v2671_v6 = vpack.c.bf16 %v1318_v4, %v1317_v2  ;;  %v1302_v8 = vld [vmem:[%s4557_s2 + $0x58] sm:$0xff] }
 0x46e   : > { %v1141_v11 = vpop.permute.xlu0 %1140  ;;  %v1138_v18 = vpop.permute.xlu1 %1137 }
 0x46f   : > { %v1154_v19 = vsel %vm720_vm13, %v1153_v30, %v1138_v18  ;;  %v1320_v30 = vld [vmem:[%s4557_s2 + $0xe8] sm:$0xff]  ;;  %v2673_v18 = vpack.c.bf16 %v1302_v8, %v1301_v7 }
 0x470   : > { %v1155_v16 = vsel %vm693_vm9, %v1154_v19, %v1141_v11  ;;  %v1319_v11 = vld [vmem:[%s4557_s2 + $0xe0] sm:$0xff]  ;;  %v1348_v7 = vld [vmem:[%s4557_s2 + $0x1c8] sm:$0xff] }
 0x471   : > { %v2675_v19 = vpack.c.bf16 %v1320_v30, %v1319_v11 }
 0x472   : > { %v1144_v27 = vpop.permute.xlu1 %1143  ;;  %v1147_v29 = vpop.permute.xlu0 %1146 }
 0x473   : > { %v1156_v12 = vsel %vm179_vm5, %v1155_v16, %v1144_v27  ;;  %v1303_v16 = vld [vmem:[%s4557_s2 + $0x60] sm:$0xff]  ;;  %v1304_v27 = vld [vmem:[%s4557_s2 + $0x68] sm:$0xff] }
 0x474   : > { %v1157_v15 = vsel %vm1053_vm2, %v1156_v12, %v1147_v29  ;;  %v1339_v29 = vld [vmem:[%s4557_s2 + $0x180] sm:$0xff]  ;;  %v2677_v12 = vpack.c.bf16 %v1304_v27, %v1303_v16 }
 0x476   : > { %v1150_v14 = vpop.permute.xlu1 %1149 }
 0x477   : > { %v1158_v25 = vsel %vm1055_vm3, %v1157_v15, %v1150_v14  ;;  %v1340_v15 = vld [vmem:[%s4557_s2 + $0x188] sm:$0xff]  ;;  %v1323_v14 = vld [vmem:[%s4557_s2 + $0x100] sm:$0xff] }
 0x478   : > { %v1162_v31 = vrot.slane %v1158_v25, %v3602_v13  ;;  %v1324_v25 = vld [vmem:[%s4557_s2 + $0x108] sm:$0xff] }
 0x47a   : > { %v1164_v24 = vmul.f32 %v1162_v31, %v3611_v21  ;;  %v1163_v35 = vmul.f32 %v1162_v31, %v3608_v20  ;;  %v1166_v38 = vmul.f32 %v1162_v31, %v3617_v23  ;;  %v1165_v1 = vmul.f32 %v1162_v31, %v3614_v41 }
 0x47b   : > { %v1168_v3 = vmul.f32 %v1162_v31, %v3629_v9  ;;  %v1167_v39 = vmul.f32 %v1162_v31, %v3620_v26  ;;  %v1170_v23 = vmul.f32 %v1162_v31, %v3642_v22  ;;  %v1169_v41 = vmul.f32 %v1162_v31, %v3636_v10  ;;  %v1307_v26 = vld [vmem:[%s4557_s2 + $0x80] sm:$0xff]  ;;  %v1308_v9 = vld [vmem:[%s4557_s2 + $0x88] sm:$0xff] }
 0x47c   : > { %v1172_v36 = vmax.f32 %v1164_v24, 0.0  ;;  %v1171_v37 = vmax.f32 %v1163_v35, 0.0  ;;  %v1174_v0 = vmax.f32 %v1166_v38, 0.0  ;;  %v1173_v63 = vmax.f32 %v1165_v1, 0.0  ;;  %v1291_v10 = vld [vmem:[%s4557_s2] sm:$0xff]  ;;  %v1321_v35 = vld [vmem:[%s4557_s2 + $0xf0] sm:$0xff] }
 0x47d   : > { %v1176_v20 = vmax.f32 %v1168_v3, 0.0  ;;  %v1175_v21 = vmax.f32 %v1167_v39, 0.0  ;;  %v1178_v40 = vmax.f32 %v1170_v23, 0.0  ;;  %v1177_v42 = vmax.f32 %v1169_v41, 0.0  ;;  %v1341_v3 = vld [vmem:[%s4557_s2 + $0x190] sm:$0xff]  ;;  %v1326_v23 = vld [vmem:[%s4557_s2 + $0x118] sm:$0xff] }
 0x47e   : > { %1259 = vrot.lane.b32.xlu1 %v1172_v36, %s3031_s16  ;;  %1257 = vrot.lane.b32.xlu0 %v1171_v37, %s3031_s16  ;;  %v2651_v22 = vpack.c.bf16 %v1308_v9, %v1307_v26  ;;  %v2653_v34 = vpack.c.bf16 %v1292_v33, %v1291_v10  ;;  %v2683_v31 = vpack.c.bf16 %v1340_v15, %v1339_v29  ;;  %v1322_v36 = vld [vmem:[%s4557_s2 + $0xf8] sm:$0xff]  ;;  %v1397_v9 = vld [vmem:[#allocation3 + $0x2] sm:$0xff]  ;;  %v3034_v10 = vmov 0.0|0.0   ;;  %v1349_v15 = vld [vmem:[%s4557_s2 + $0x1d0] sm:$0xff] }
 0x47f   : > { %v2685_v24 = vpack.c.bf16 %v1324_v25, %v1323_v14  ;;  %v2679_v1 = vpack.c.bf16 %v1322_v36, %v1321_v35  ;;  %v1344_v33 = vld [vmem:[%s4557_s2 + $0x1a8] sm:$0xff]  ;;  %v1331_v29 = vld [vmem:[%s4557_s2 + $0x140] sm:$0xff]  ;;  %v1350_v25 = vld [vmem:[%s4557_s2 + $0x1d8] sm:$0xff] }
 0x480   : > { %2652 = vmatprep.subr.bf16.mxu1 %v2651_v22  ;;  %2684 = vmatprep.subr.bf16.mxu0 %v2683_v31  ;;  %v1343_v22 = vld [vmem:[%s4557_s2 + $0x1a0] sm:$0xff]  ;;  %v2703_v35 = vpack.c.bf16 %v1350_v25, %v1349_v15 }
 0x481   : > { %2654 = vmatpush3.bf16.msra.mxu1 %v2653_v34  ;;  %2686 = vmatpush3.bf16.msra.mxu0 %v2685_v24  ;;  %v2691_v44 = vpack.c.bf16 %v1344_v33, %v1343_v22  ;;  %v1327_v34 = vld [vmem:[%s4557_s2 + $0x120] sm:$0xff]  ;;  %v1336_v22 = vld [vmem:[%s4557_s2 + $0x168] sm:$0xff]  ;;  %v1353_v33 = vld [vmem:[%s4557_s2 + $0x1f0] sm:$0xff] }
 0x482   : > { %1263 = vrot.lane.b32.xlu1 %v1174_v0, %s3031_s16  ;;  %1261 = vrot.lane.b32.xlu0 %v1173_v63, %s3031_s16  ;;  %v1305_v0 = vld [vmem:[%s4557_s2 + $0x70] sm:$0xff]  ;;  %v1306_v63 = vld [vmem:[%s4557_s2 + $0x78] sm:$0xff] }
 0x483   : > { %2656 = vmatprep.subr.bf16.mxu1 %v2655_v45  ;;  %v2681_v39 = vpack.c.bf16 %v1306_v63, %v1305_v0  ;;  %v1328_v45 = vld [vmem:[%s4557_s2 + $0x128] sm:$0xff]  ;;  %v1333_v63 = vld [vmem:[%s4557_s2 + $0x150] sm:$0xff] }
 0x484   : > { %v2693_v43 = vpack.c.bf16 %v1328_v45, %v1327_v34 }
 0x485   : > { %2658 = vmatpush3.bf16.msra.mxu1 %v2657_v48 }
 0x486   : > { %1267 = vrot.lane.b32.xlu1 %v1176_v20, %s3031_s16  ;;  %1265 = vrot.lane.b32.xlu0 %v1175_v21, %s3031_s16  ;;  %v1342_v20 = vld [vmem:[%s4557_s2 + $0x198] sm:$0xff]  ;;  %v1325_v21 = vld [vmem:[%s4557_s2 + $0x110] sm:$0xff] }
 0x487   : > { %2660 = vmatprep.subr.bf16.mxu1 %v2659_v49  ;;  %v2687_v41 = vpack.c.bf16 %v1342_v20, %v1341_v3  ;;  %v1334_v3 = vld [vmem:[%s4557_s2 + $0x158] sm:$0xff]  ;;  %v1351_v20 = vld [vmem:[%s4557_s2 + $0x1e0] sm:$0xff] }
 0x489   : > { %2662 = vmatpush3.bf16.msra.mxu1 %v2661_v56  ;;  %2688 = vmatprep.subr.bf16.mxu0 %v2687_v41  ;;  %v1346_v56 = vld [vmem:[%s4557_s2 + $0x1b8] sm:$0xff] }
 0x48a   : > { %1271 = vrot.lane.b32.xlu1 %v1178_v40, %s3031_s16  ;;  %1269 = vrot.lane.b32.xlu0 %v1177_v42, %s3031_s16  ;;  %v2689_v40 = vpack.c.bf16 %v1326_v23, %v1325_v21  ;;  %v1352_v21 = vld [vmem:[%s4557_s2 + $0x1e8] sm:$0xff] }
 0x48b   : > { %2664 = vmatprep.subr.bf16.mxu1 %v2663_v57  ;;  %v2695_v57 = vpack.c.bf16 %v1346_v56, %v1345_v53 }
 0x48c   : > { %2690 = vmatpush3.bf16.msra.mxu0 %v2689_v40  ;;  %v2707_v40 = vpack.c.bf16 %v1352_v21, %v1351_v20  ;;  %v1358_v20 = vld [vmem:[%s4557_s2 + $0x218] sm:$0xff] }
 0x48d   : > { %2666 = vmatpush3.bf16.msra.mxu1 %v2665_v59  ;;  %2692 = vmatprep.subr.bf16.mxu0 %v2691_v44  ;;  %v1329_v59 = vld [vmem:[%s4557_s2 + $0x130] sm:$0xff] }
 0x48e   : > { %2668 = vmatprep.subr.bf16.mxu1 %v2667_v60 }
 0x490   : > { %2694 = vmatpush3.bf16.msra.mxu0 %v2693_v43 }
 0x491   : > { %2670 = vmatpush3.bf16.msra.mxu1 %v2669_v5  ;;  %2696 = vmatprep.subr.bf16.mxu0 %v2695_v57  ;;  %v1330_v5 = vld [vmem:[%s4557_s2 + $0x138] sm:$0xff] }
 0x492   : > { %2672 = vmatprep.subr.bf16.mxu1 %v2671_v6  ;;  %v1347_v6 = vld [vmem:[%s4557_s2 + $0x1c0] sm:$0xff]  ;;  %v2697_v8 = vpack.c.bf16 %v1330_v5, %v1329_v59 }
 0x493   : > { %v2699_v11 = vpack.c.bf16 %v1348_v7, %v1347_v6  ;;  %v1437_v7 = vld [vmem:[#allocation3 + $0x90] sm:$0xff] }
 0x494   : > { %2698 = vmatpush3.bf16.msra.mxu0 %v2697_v8  ;;  %v1445_v8 = vld [vmem:[#allocation3 + $0x91] sm:$0xff] }
 0x495   : > { %2674 = vmatpush3.bf16.msra.mxu1 %v2673_v18  ;;  %2700 = vmatprep.subr.bf16.mxu0 %v2699_v11 }
 0x496   : > { %2676 = vmatprep.subr.bf16.mxu1 %v2675_v19 }
 0x499   : > { %2678 = vmatpush3.bf16.msra.mxu1 %v2677_v12  ;;  %v1332_v12 = vld [vmem:[%s4557_s2 + $0x148] sm:$0xff] }
 0x49a   : > { %2680 = vmatprep.subr.bf16.mxu1 %v2679_v1  ;;  %v2701_v14 = vpack.c.bf16 %v1332_v12, %v1331_v29  ;;  %v1355_v29 = vld [vmem:[%s4557_s2 + $0x200] sm:$0xff]  ;;  %v1356_v12 = vld [vmem:[%s4557_s2 + $0x208] sm:$0xff] }
 0x49c   : > { %2702 = vmatpush3.bf16.msra.mxu0 %v2701_v14 }
 0x49d   : > { %2682 = vmatpush3.bf16.msra.mxu1 %v2681_v39  ;;  %2704 = vmatprep.subr.bf16.mxu0 %v2703_v35  ;;  %v2705_v39 = vpack.c.bf16 %v1334_v3, %v1333_v63  ;;  %v2716_v63 = vpack.c.bf16 %v1356_v12, %v1355_v29 }
 0x49e   : > { %2715 = vmatprep.subr.bf16.mxu1 %v3034_v10 }
 0x4a0   : > { %2706 = vmatpush3.bf16.msra.mxu0 %v2705_v39  ;;  %v1357_v39 = vld [vmem:[%s4557_s2 + $0x210] sm:$0xff] }
 0x4a1   : > { %2708 = vmatprep.subr.bf16.mxu0 %v2707_v40 }
 0x4f0   : > { %v1260_v37 = vpop.permute.xlu1 %1259  ;;  %v1258_v38 = vpop.permute.xlu0 %1257 }
 0x4f1   : > { %1284 = vst.msk [vmem:[#allocation3 + $0x21] sm:$0xff] %vm1282_vm15, %v1260_v37  ;;  %1283 = vst.msk [vmem:[#allocation3 + $0x11] sm:$0xff] %vm1282_vm15, %v1258_v38 }
 0x4f4   : > { %v1264_v42 = vpop.permute.xlu1 %1263  ;;  %v1262_v26 = vpop.permute.xlu0 %1261 }
 0x4f5   : > { %1286 = vst.msk [vmem:[#allocation3 + $0x41] sm:$0xff] %vm1282_vm15, %v1264_v42  ;;  %1285 = vst.msk [vmem:[#allocation3 + $0x31] sm:$0xff] %vm1282_vm15, %v1262_v26  ;;  %v1335_v42 = vld [vmem:[%s4557_s2 + $0x160] sm:$0xff] }
 0x4f6   : > { %v2709_v45 = vpack.c.bf16 %v1336_v22, %v1335_v42 }
 0x4f8   : > { %v1268_v46 = vpop.permute.xlu1 %1267  ;;  %v1266_v17 = vpop.permute.xlu0 %1265  ;;  %v3962_v47 = vld [vmem:[#allocation3 + $0x12] sm:$0xff]  ;;  %v3972_v52 = vld [vmem:[#allocation3 + $0x20] sm:$0xff]  ;;  %2710 = vmatpush3.bf16.msra.mxu0 %v2709_v45 }
 0x4f9   : > { %v3964_v48 = vld [vmem:[#allocation3 + $0x11] sm:$0xff]  ;;  %1288 = vst.msk [vmem:[#allocation3 + $0x61] sm:$0xff] %vm1282_vm15, %v1268_v46  ;;  %1287 = vst.msk [vmem:[#allocation3 + $0x51] sm:$0xff] %vm1282_vm15, %v1266_v17  ;;  %v2885_v49 = vpack.i.bf16 %v3962_v47, %v1397_v9  ;;  %v3982_v58 = vld [vmem:[#allocation3 + $0x21] sm:$0xff] }
 0x4fa   : > { %v2880_v50 = vpack.i.bf16 %v3964_v48, %v1389_v32  ;;  %v3970_v51 = vld [vmem:[#allocation3 + $0x10] sm:$0xff]  ;;  %v4015_v30 = vld [vmem:[#allocation3 + $0x22] sm:$0xff]  ;;  %v1354_v32 = vld [vmem:[%s4557_s2 + $0x1f8] sm:$0xff]  ;;  %v2940_v57 = vpack.i.bf16 %v3982_v58, %v3964_v48 }
 0x4fb   : > { %2886 = vrot.lane.b32.xlu1 %v2885_v49, %s3021_s18  ;;  %v2890_v60 = vpack.i.bf16 %v3972_v52, %v3970_v51  ;;  %v2711_v43 = vpack.c.bf16 %v1354_v32, %v1353_v33  ;;  %v1337_v46 = vld [vmem:[%s4557_s2 + $0x170] sm:$0xff]  ;;  %v1338_v17 = vld [vmem:[%s4557_s2 + $0x178] sm:$0xff] }
 0x4fc   : > { %2881 = vrot.lane.b32.xlu0 %v2880_v50, %s3025_s24  ;;  %v1272_v54 = vpop.permute.xlu1 %1271  ;;  %v1270_v55 = vpop.permute.xlu0 %1269  ;;  %v3984_v28 = vld [vmem:[#allocation3 + $0x31] sm:$0xff]  ;;  %v4001_v4 = vld [vmem:[#allocation3 + $0x40] sm:$0xff]  ;;  %v2713_v56 = vpack.c.bf16 %v1338_v17, %v1337_v46  ;;  %v1360_v46 = vld [vmem:[%s4557_s2 + $0x228] sm:$0xff] }
 0x4fd   : > { %1290 = vst.msk [vmem:[#allocation3 + $0x81] sm:$0xff] %vm1282_vm15, %v1272_v54  ;;  %1289 = vst.msk [vmem:[#allocation3 + $0x71] sm:$0xff] %vm1282_vm15, %v1270_v55  ;;  %v3995_v61 = vpack.i.bf16 %v3984_v28, %v3982_v58  ;;  %v3997_v62 = vld [vmem:[#allocation3 + $0x32] sm:$0xff]  ;;  %v4039_v31 = vld [vmem:[#allocation3 + $0x42] sm:$0xff]  ;;  %2712 = vmatprep.subr.bf16.mxu0 %v2711_v43  ;;  %v2945_v54 = vpack.i.bf16 %v4015_v30, %v3962_v47 }
 0x4fe   : > { %v3999_v2 = vld [vmem:[#allocation3 + $0x30] sm:$0xff]  ;;  %v2900_v18 = vpack.i.bf16 %v3997_v62, %v4015_v30  ;;  %v1393_v24 = vld [vmem:[#allocation3 + $0x41] sm:$0xff]  ;;  %2714 = vmatpush3.bf16.msra.mxu0 %v2713_v56  ;;  %v2965_v48 = vpack.i.bf16 %v4039_v31, %v3997_v62 }
 0x4ff   : > { %2896 = vrot.lane.b32.xlu1 %v3995_v61, %s3025_s24  ;;  %v2905_v19 = vpack.i.bf16 %v4001_v4, %v3999_v2  ;;  %v2950_v55 = vpack.i.bf16 %v3999_v2, %v3972_v52  ;;  %v2960_v59 = vpack.i.bf16 %v1393_v24, %v3984_v28  ;;  %v1359_v43 = vld [vmem:[%s4557_s2 + $0x220] sm:$0xff] }
 0x500   : > { %2891 = vrot.lane.b32.xlu0 %v2890_v60, %s3019_s20  ;;  %v4021_v16 = vld [vmem:[#allocation3 + $0x52] sm:$0xff]  ;;  %v4046_v1 = vld [vmem:[#allocation3 + $0x60] sm:$0xff] }
 0x501   : > { %v4023_v27 = vld [vmem:[#allocation3 + $0x51] sm:$0xff]  ;;  %v2915_v36 = vpack.i.bf16 %v4021_v16, %v4039_v31  ;;  %v1395_v23 = vld [vmem:[#allocation3 + $0x61] sm:$0xff] }
 0x502   : > { %v2910_v37 = vpack.i.bf16 %v4023_v27, %v1393_v24  ;;  %v4044_v38 = vld [vmem:[#allocation3 + $0x50] sm:$0xff]  ;;  %v4088_v49 = vld [vmem:[#allocation3 + $0x62] sm:$0xff]  ;;  %v2980_v58 = vpack.i.bf16 %v1395_v23, %v4023_v27 }
 0x503   : > { %2906 = vrot.lane.b32.xlu1 %v2905_v19, %s3019_s20  ;;  %v2920_v26 = vpack.i.bf16 %v4046_v1, %v4044_v38  ;;  %v2970_v47 = vpack.i.bf16 %v4044_v38, %v4001_v4  ;;  %v2985_v60 = vpack.i.bf16 %v4088_v49, %v4021_v16 }
 0x504   : > { %2901 = vrot.lane.b32.xlu0 %v2900_v18, %s3021_s18  ;;  %v1396_v0 = vld [vmem:[#allocation3 + $0x71] sm:$0xff]  ;;  %v1412_v34 = vld [vmem:[#allocation3 + $0x80] sm:$0xff] }
 0x505   : > { %v4062_v41 = vld [vmem:[#allocation3 + $0x72] sm:$0xff]  ;;  %v2925_v9 = vpack.i.bf16 %v1396_v0, %v1395_v23  ;;  %v4127_v6 = vld [vmem:[#allocation3 + $0x82] sm:$0xff] }
 0x506   : > { %v4078_v44 = vld [vmem:[#allocation3 + $0x70] sm:$0xff]  ;;  %v2930_v50 = vpack.i.bf16 %v4062_v41, %v4088_v49 }
 0x507   : > { %2916 = vrot.lane.b32.xlu1 %v2915_v36, %s3021_s18  ;;  %v2935_v53 = vpack.i.bf16 %v1412_v34, %v4078_v44  ;;  %v2990_v28 = vpack.i.bf16 %v4078_v44, %v4046_v1 }
 0x508   : > { %2911 = vrot.lane.b32.xlu0 %v2910_v37, %s3025_s24 }
 0x50b   : > { %2926 = vrot.lane.b32.xlu1 %v2925_v9, %s3025_s24 }
 0x50c   : > { %2921 = vrot.lane.b32.xlu0 %v2920_v26, %s3019_s20 }
 0x50f   : > { %2936 = vrot.lane.b32.xlu1 %v2935_v53, %s3019_s20 }
 0x510   : > { %2931 = vrot.lane.b32.xlu0 %v2930_v50, %s3021_s18 }
 0x513   : > { %2946 = vrot.lane.b32.xlu1 %v2945_v54, %s3030_s14 }
 0x514   : > { %2941 = vrot.lane.b32.xlu0 %v2940_v57, %s3026_s29 }
 0x517   : > { %2956 = vrot.lane.b32.xlu1 %v3995_v61, %s3032_s17  ;;  %v1420_v61 = vld [vmem:[#allocation3 + $0x81] sm:$0xff] }
 0x518   : > { %2951 = vrot.lane.b32.xlu0 %v2950_v55, %s3027_s9  ;;  %v3000_v5 = vpack.i.bf16 %v1420_v61, %v1396_v0  ;;  %v2722_v55 = vpack.c.bf16 %v1360_v46, %v1359_v43  ;;  %v1368_v43 = vld [vmem:[%s4557_s2 + $0x268] sm:$0xff] }
 0x51b   : > { %2966 = vrot.lane.b32.xlu1 %v2965_v48, %s3030_s14  ;;  %v1361_v48 = vld [vmem:[%s4557_s2 + $0x230] sm:$0xff] }
 0x51c   : > { %2961 = vrot.lane.b32.xlu0 %v2960_v59, %s3026_s29 }
 0x51f   : > { %2976 = vrot.lane.b32.xlu1 %v2910_v37, %s3032_s17  ;;  %v1381_v37 = vld [vmem:[#allocation3] sm:$0xff] }
 0x520   : > { %2971 = vrot.lane.b32.xlu0 %v2970_v47, %s3027_s9 }
 0x523   : > { %2986 = vrot.lane.b32.xlu1 %v2985_v60, %s3030_s14 }
 0x524   : > { %2981 = vrot.lane.b32.xlu0 %v2980_v58, %s3026_s29 }
 0x527   : > { %2996 = vrot.lane.b32.xlu1 %v2925_v9, %s3032_s17 }
 0x528   : > { %2991 = vrot.lane.b32.xlu0 %v2990_v28, %s3027_s9 }
 0x52b   : > { %1602 = vrot.lane.b32.xlu1 %v4062_v41, %s3030_s14 }
 0x52c   : > { %3001 = vrot.lane.b32.xlu0 %v3000_v5, %s3026_s29 }
 0x52f   : > { %1604 = vrot.lane.b32.xlu1 %v4127_v6, %s3030_s14 }
 0x530   : > { %1634 = vrot.lane.b32.xlu0 %v1412_v34, %s3027_s9  ;;  %v2719_v34 = vpack.c.bf16 %v1358_v20, %v1357_v39 }
 0x533   : > { %1666 = vrot.lane.b32.xlu1 %v1420_v61, %s3032_s17 }
 0x534   : > { %1636 = vrot.lane.b32.xlu0 %v1437_v7, %s3027_s9 }
 0x538   : > { %1668 = vrot.lane.b32.xlu0 %v1445_v8, %s3032_s17 }
 0x56d   : > { %v2887_v11 = vpop.permute.xlu1 %2886 }
 0x56e   : > { %v2882_v18 = vpop.permute.xlu0 %2881  ;;  %v2888_v19 = vunpack.i.l.bf16 %v2887_v11  ;;  %v2889_v15 = vunpack.i.h.bf16 %v2887_v11  ;;  %v1363_v11 = vld [vmem:[%s4557_s2 + $0x240] sm:$0xff] }
 0x56f   : > { %v2883_v27 = vunpack.i.l.bf16 %v2882_v18  ;;  %v2884_v14 = vunpack.i.h.bf16 %v2882_v18 }
 0x571   : > { %v2897_v25 = vpop.permute.xlu1 %2896  ;;  %v1686_v0 = vsel %vm693_vm9, %v2883_v27, %v2888_v19  ;;  %v1678_v40 = vsel %vm675_vm8, %v1381_v37, %v2883_v27  ;;  %v1687_v42 = vsel %vm693_vm9, %v2884_v14, %v2889_v15  ;;  %v1679_v56 = vsel %vm675_vm8, %v3970_v51, %v2884_v14  ;;  %v1362_v51 = vld [vmem:[%s4557_s2 + $0x238] sm:$0xff] }
 0x572   : > { %v4141_v24 = vpop.permute.xlu0 %2891  ;;  %v2898_v26 = vunpack.i.l.bf16 %v2897_v25  ;;  %v2899_v17 = vunpack.i.h.bf16 %v2897_v25  ;;  %v2725_v8 = vpack.c.bf16 %v1362_v51, %v1361_v48 }
 0x573   : > { %v2894_v35 = vunpack.i.h.bf16 %v4141_v24  ;;  %v2893_v36 = vunpack.i.l.bf16 %v4141_v24  ;;  %v1373_v24 = vld [vmem:[%s4557_s2 + $0x290] sm:$0xff] }
 0x574   : > { %v1680_v61 = vsel %vm675_vm8, %v3972_v52, %v2898_v26  ;;  %v1364_v52 = vld [vmem:[%s4557_s2 + $0x248] sm:$0xff]  ;;  %v1681_v12 = vsel %vm675_vm8, %v3999_v2, %v2899_v17  ;;  %v1366_v2 = vld [vmem:[%s4557_s2 + $0x258] sm:$0xff] }
 0x575   : > { %v1694_v3 = vsel %vm711_vm11, %v1686_v0, %v2893_v36  ;;  %v4155_v21 = vpop.permute.xlu1 %2906  ;;  %v1695_v33 = vsel %vm711_vm11, %v1687_v42, %v2894_v35  ;;  %v2728_v0 = vpack.c.bf16 %v1364_v52, %v1363_v11 }
 0x576   : > { %v2902_v23 = vpop.permute.xlu0 %2901  ;;  %1823 = vmatprep.mubr.f32.mxu1 %v1694_v3  ;;  %v2908_v9 = vunpack.i.l.bf16 %v4155_v21  ;;  %v2909_v54 = vunpack.i.h.bf16 %v4155_v21  ;;  %v1378_v21 = vld [vmem:[%s4557_s2 + $0x2b8] sm:$0xff] }
 0x577   : > { %v2903_v22 = vunpack.i.l.bf16 %v2902_v23  ;;  %1824 = vmatmul.mubr.f32.vlgmr.msra.gmra.mrb[0].mxu1 %v1678_v40  ;;  %v2904_v32 = vunpack.i.h.bf16 %v2902_v23 }
 0x578   : > { %2717 = vmatpush1.bf16.msra.mxu1 %v2716_v63  ;;  %1828 = vmatprep.mubr.f32.mxu1 %v1695_v33  ;;  %v1365_v63 = vld [vmem:[%s4557_s2 + $0x250] sm:$0xff] }
 0x579   : > { %2718 = vmatprep.subr.bf16.mxu1 %v3034_v10  ;;  %v1688_v45 = vsel %vm693_vm9, %v2898_v26, %v2903_v22  ;;  %v2917_v50 = vpop.permute.xlu1 %2916  ;;  %v1689_v59 = vsel %vm693_vm9, %v2899_v17, %v2904_v32  ;;  %v2731_v22 = vpack.c.bf16 %v1366_v2, %v1365_v63 }
 0x57a   : > { %v4171_v53 = vpop.permute.xlu0 %2911  ;;  %v1696_v57 = vsel %vm711_vm11, %v1688_v45, %v2908_v9  ;;  %v2918_v47 = vunpack.i.l.bf16 %v2917_v50  ;;  %v1697_v7 = vsel %vm711_vm11, %v1689_v59, %v2909_v54  ;;  %v2919_v18 = vunpack.i.h.bf16 %v2917_v50 }
 0x57b   : > { %1829 = vmatmul.mubr.f32.gmra.mrb[2].mxu1 %v1679_v56  ;;  %v2913_v58 = vunpack.i.l.bf16 %v4171_v53  ;;  %v2914_v19 = vunpack.i.h.bf16 %v4171_v53 }
 0x57c   : > { %2720 = vmatpush1.bf16.msra.mxu1 %v2719_v34  ;;  %1833 = vmatprep.mubr.f32.mxu1 %v1696_v57 }
 0x57d   : > { %2721 = vmatprep.subr.bf16.mxu1 %v3034_v10  ;;  %v4188_v60 = vpop.permute.xlu1 %2926  ;;  %v1690_v15 = vsel %vm693_vm9, %v2913_v58, %v2918_v47  ;;  %v1682_v23 = vsel %vm675_vm8, %v4001_v4, %v2913_v58  ;;  %v1691_v40 = vsel %vm693_vm9, %v2914_v19, %v2919_v18  ;;  %v1367_v4 = vld [vmem:[%s4557_s2 + $0x260] sm:$0xff]  ;;  %v1683_v56 = vsel %vm675_vm8, %v4044_v38, %v2914_v19 }
 0x57e   : > { %v4190_v28 = vpop.permute.xlu0 %2921  ;;  %v2928_v3 = vunpack.i.l.bf16 %v4188_v60  ;;  %v2929_v46 = vunpack.i.h.bf16 %v4188_v60  ;;  %v2734_v58 = vpack.c.bf16 %v1368_v43, %v1367_v4 }
 0x57f   : > { %v2923_v5 = vunpack.i.l.bf16 %v4190_v28  ;;  %1834 = vmatmul.mubr.f32.gmra.mrb[4].mxu1 %v1680_v61  ;;  %v2924_v14 = vunpack.i.h.bf16 %v4190_v28  ;;  %v1369_v61 = vld [vmem:[%s4557_s2 + $0x270] sm:$0xff] }
 0x580   : > { %2723 = vmatpush1.bf16.msra.mxu1 %v2722_v55  ;;  %1838 = vmatprep.mubr.f32.mxu1 %v1697_v7  ;;  %v1370_v7 = vld [vmem:[%s4557_s2 + $0x278] sm:$0xff]  ;;  %v1684_v52 = vsel %vm675_vm8, %v4046_v1, %v2928_v3 }
 0x581   : > { %2724 = vmatprep.subr.bf16.mxu1 %v3034_v10  ;;  %v4206_v27 = vpop.permute.xlu1 %2936  ;;  %v1698_v25 = vsel %vm711_vm11, %v1690_v15, %v2923_v5  ;;  %v1699_v26 = vsel %vm711_vm11, %v1691_v40, %v2924_v14 }
 0x582   : > { %v2932_v29 = vpop.permute.xlu0 %2931  ;;  %v2938_v42 = vunpack.i.l.bf16 %v4206_v27  ;;  %v2939_v17 = vunpack.i.h.bf16 %v4206_v27 }
 0x583   : > { %1839 = vmatmul.mubr.f32.gmra.mrb[6].mxu1 %v1681_v12  ;;  %v2933_v37 = vunpack.i.l.bf16 %v2932_v29  ;;  %v2934_v33 = vunpack.i.h.bf16 %v2932_v29 }
 0x584   : > { %2726 = vmatpush1.bf16.msra.mxu1 %v2725_v8  ;;  %1843 = vmatprep.mubr.f32.mxu1 %v1698_v25  ;;  %v2737_v25 = vpack.c.bf16 %v1370_v7, %v1369_v61 }
 0x585   : > { %2727 = vmatprep.subr.bf16.mxu1 %v3034_v10  ;;  %v2947_v39 = vpop.permute.xlu1 %2946  ;;  %v1692_v45 = vsel %vm693_vm9, %v2928_v3, %v2933_v37  ;;  %v1693_v38 = vsel %vm693_vm9, %v2929_v46, %v2934_v33  ;;  %v1372_v37 = vld [vmem:[%s4557_s2 + $0x288] sm:$0xff] }
 0x586   : > { %v4223_v20 = vpop.permute.xlu0 %2941  ;;  %v2948_v32 = vunpack.i.l.bf16 %v2947_v39  ;;  %v2949_v57 = vunpack.i.h.bf16 %v2947_v39  ;;  %v1700_v48 = vsel %vm711_vm11, %v1692_v45, %v2938_v42  ;;  %v1701_v19 = vsel %vm711_vm11, %v1693_v38, %v2939_v17 }
 0x587   : > { %1844 = vmatmul.mubr.f32.gmra.mrb[8].mxu1 %v1682_v23  ;;  %v2943_v34 = vunpack.i.l.bf16 %v4223_v20  ;;  %v2944_v55 = vunpack.i.h.bf16 %v4223_v20  ;;  %v1685_v39 = vsel %vm675_vm8, %v4078_v44, %v2929_v46 }
 0x588   : > { %2729 = vmatpush1.bf16.msra.mxu1 %v2728_v0  ;;  %1848 = vmatprep.mubr.f32.mxu1 %v1699_v26 }
 0x589   : > { %2730 = vmatprep.subr.bf16.mxu1 %v3034_v10  ;;  %v4243_v50 = vpop.permute.xlu1 %2956  ;;  %v1710_v47 = vsel %vm1048_vm1, %v2943_v34, %v2948_v32  ;;  %v1702_v18 = vsel %vm729_vm14, %v2893_v36, %v2943_v34  ;;  %v1711_v29 = vsel %vm1048_vm1, %v2944_v55, %v2949_v57  ;;  %v1371_v36 = vld [vmem:[%s4557_s2 + $0x280] sm:$0xff]  ;;  %v1703_v20 = vsel %vm729_vm14, %v2894_v35, %v2944_v55  ;;  %v1374_v35 = vld [vmem:[%s4557_s2 + $0x298] sm:$0xff] }
 0x58a   : > { %v4245_v53 = vpop.permute.xlu0 %2951  ;;  %v2743_v46 = vpack.c.bf16 %v1374_v35, %v1373_v24  ;;  %v2959_v24 = vunpack.i.h.bf16 %v4243_v50 }
 0x58b   : > { %v2953_v59 = vunpack.i.l.bf16 %v4245_v53  ;;  %1849 = vmatmul.mubr.f32.gmra.mrb[10].mxu1 %v1683_v56  ;;  %v2954_v51 = vunpack.i.h.bf16 %v4245_v53  ;;  %v1375_v56 = vld [vmem:[%s4557_s2 + $0x2a0] sm:$0xff] }
 0x58c   : > { %2732 = vmatpush1.bf16.msra.mxu1 %v2731_v22  ;;  %1853 = vmatprep.mubr.f32.mxu1 %v1700_v48  ;;  %v2740_v22 = vpack.c.bf16 %v1372_v37, %v1371_v36 }
 0x58d   : > { %v1719_v60 = vsel %vm1718_vm4, %v1710_v47, %v2953_v59  ;;  %2733 = vmatprep.subr.bf16.mxu1 %v3034_v10  ;;  %v2967_v8 = vpop.permute.xlu1 %2966  ;;  %v1720_v1 = vsel %vm1718_vm4, %v1711_v29, %v2954_v51 }
 0x58e   : > { %v2962_v11 = vpop.permute.xlu0 %2961  ;;  %1928 = vmatprep.mubr.f32.mxu0 %v1719_v60  ;;  %v2968_v12 = vunpack.i.l.bf16 %v2967_v8  ;;  %v2969_v0 = vunpack.i.h.bf16 %v2967_v8 }
 0x58f   : > { %1854 = vmatmul.mubr.f32.gmra.mrb[12].mxu1 %v1684_v52  ;;  %1929 = vmatmul.mubr.f32.vlgmr.msra.gmra.mrb[24].mxu0 %v1702_v18  ;;  %v2963_v15 = vunpack.i.l.bf16 %v2962_v11  ;;  %v2964_v63 = vunpack.i.h.bf16 %v2962_v11  ;;  %v1377_v11 = vld [vmem:[%s4557_s2 + $0x2b0] sm:$0xff] }
 0x590   : > { %2735 = vmatpush1.bf16.msra.mxu1 %v2734_v58  ;;  %1858 = vmatprep.mubr.f32.mxu1 %v1701_v19 }
 0x591   : > { %1933 = vmatprep.mubr.f32.mxu0 %v1720_v1  ;;  %2736 = vmatprep.subr.bf16.mxu1 %v3034_v10  ;;  %v4286_v2 = vpop.permute.xlu1 %2976  ;;  %v1712_v26 = vsel %vm1048_vm1, %v2963_v15, %v2968_v12  ;;  %v1713_v34 = vsel %vm1048_vm1, %v2964_v63, %v2969_v0  ;;  %v1705_v58 = vsel %vm729_vm14, %v2909_v54, %v2964_v63 }
 0x592   : > { %v4288_v3 = vpop.permute.xlu0 %2971 }
 0x593   : > { %v2974_v23 = vunpack.i.h.bf16 %v4288_v3  ;;  %v2973_v40 = vunpack.i.l.bf16 %v4288_v3  ;;  %1859 = vmatmul.mubr.f32.gmra.mrb[14].mxu1 %v1685_v39  ;;  %1934 = vmatmul.mubr.f32.gmra.mrb[26].mxu0 %v1703_v20 }
 0x594   : > { %2738 = vmatpush1.bf16.msra.mxu1 %v2737_v25  ;;  %2356 = vmatprep.mubr.msk.f32.mxu1 %vm675_vm8, %v4015_v30  ;;  %v1704_v30 = vsel %vm729_vm14, %v2908_v9, %v2963_v15  ;;  %v1376_v9 = vld [vmem:[%s4557_s2 + $0x2a8] sm:$0xff]  ;;  %v2749_v15 = vpack.c.bf16 %v1378_v21, %v1377_v11  ;;  %v1379_v25 = vld [vmem:[%s4557_s2 + $0x2c0] sm:$0xff] }
 0x595   : > { %v1721_v44 = vsel %vm1718_vm4, %v1712_v26, %v2973_v40  ;;  %2739 = vmatprep.subr.bf16.mxu1 %v3034_v10  ;;  %v2987_v33 = vpop.permute.xlu1 %2986  ;;  %v1722_v45 = vsel %vm1718_vm4, %v1713_v34, %v2974_v23  ;;  %v2746_v7 = vpack.c.bf16 %v1376_v9, %v1375_v56  ;;  %v2958_v26 = vunpack.i.l.bf16 %v4243_v50 }
 0x596   : > { %v2982_v32 = vpop.permute.xlu0 %2981  ;;  %1938 = vmatprep.mubr.f32.mxu0 %v1721_v44  ;;  %v2988_v4 = vunpack.i.l.bf16 %v2987_v33  ;;  %v2989_v57 = vunpack.i.h.bf16 %v2987_v33  ;;  %v1728_v33 = vsel %vm1053_vm2, %v2954_v51, %v2959_v24  ;;  %v2979_v50 = vunpack.i.h.bf16 %v4286_v2  ;;  %v1453_v51 = vld [vmem:[#allocation3 + $0x92] sm:$0xff] }
 0x597   : > { %1939 = vmatmul.mubr.f32.gmra.mrb[28].mxu0 %v1704_v30  ;;  %v2983_v43 = vunpack.i.l.bf16 %v2982_v32  ;;  %v2984_v55 = vunpack.i.h.bf16 %v2982_v32 }
 0x598   : > { %2741 = vmatpush1.bf16.msra.mxu1 %v2740_v22  ;;  %1943 = vmatprep.mubr.f32.mxu0 %v1722_v45 }
 0x599   : > { %2742 = vmatprep.subr.bf16.mxu1 %v3034_v10  ;;  %v4324_v48 = vpop.permute.xlu1 %2996  ;;  %v1714_v61 = vsel %vm1048_vm1, %v2983_v43, %v2988_v4  ;;  %v1706_v18 = vsel %vm729_vm14, %v2923_v5, %v2983_v43  ;;  %v1715_v19 = vsel %vm1048_vm1, %v2984_v55, %v2989_v57  ;;  %v1380_v5 = vld [vmem:[%s4557_s2 + $0x2c8] sm:$0xff]  ;;  %v1707_v37 = vsel %vm729_vm14, %v2924_v14, %v2984_v55 }
 0x59a   : > { %v4326_v47 = vpop.permute.xlu0 %2991  ;;  %v2752_v20 = vpack.c.bf16 %v1380_v5, %v1379_v25 }
 0x59b   : > { %v2994_v38 = vunpack.i.h.bf16 %v4326_v47  ;;  %v2993_v60 = vunpack.i.l.bf16 %v4326_v47  ;;  %1944 = vmatmul.mubr.f32.gmra.mrb[30].mxu0 %v1705_v58 }
 0x59c   : > { %2744 = vmatpush1.bf16.msra.mxu1 %v2743_v46 }
 0x59d   : > { %v1723_v8 = vsel %vm1718_vm4, %v1714_v61, %v2993_v60  ;;  %2745 = vmatprep.subr.bf16.mxu1 %v3034_v10  ;;  %v1603_v54 = vpop.permute.xlu1 %1602  ;;  %v1724_v12 = vsel %vm1718_vm4, %v1715_v19, %v2994_v38 }
 0x59e   : > { %v3002_v52 = vpop.permute.xlu0 %3001  ;;  %1948 = vmatprep.mubr.f32.mxu0 %v1723_v8 }
 0x59f   : > { %v3003_v29 = vunpack.i.l.bf16 %v3002_v52  ;;  %1949 = vmatmul.mubr.f32.gmra.mrb[32].mxu0 %v1706_v18  ;;  %v3004_v39 = vunpack.i.h.bf16 %v3002_v52 }
 0x5a0   : > { %2747 = vmatpush1.bf16.msra.mxu1 %v2746_v7  ;;  %1953 = vmatprep.mubr.f32.mxu0 %v1724_v12 }
 0x5a1   : > { %2748 = vmatprep.subr.bf16.mxu1 %v3034_v10  ;;  %v1716_v1 = vsel %vm1048_vm1, %v3003_v29, %v1603_v54  ;;  %v1605_v0 = vpop.permute.xlu1 %1604  ;;  %v1708_v28 = vsel %vm729_vm14, %v2938_v42, %v3003_v29  ;;  %v1709_v35 = vsel %vm729_vm14, %v2939_v17, %v3004_v39  ;;  %v2978_v42 = vunpack.i.l.bf16 %v4286_v2 }
 0x5a2   : > { %v1635_v36 = vpop.permute.xlu0 %1634  ;;  %v1717_v22 = vsel %vm1048_vm1, %v3004_v39, %v1605_v0  ;;  %v1730_v17 = vsel %vm1053_vm2, %v2974_v23, %v2979_v50 }
 0x5a3   : > { %1954 = vmatmul.mubr.f32.gmra.mrb[34].mxu0 %v1707_v37  ;;  %v1725_v63 = vsel %vm1718_vm4, %v1716_v1, %v1635_v36  ;;  %v1729_v27 = vsel %vm1053_vm2, %v2973_v40, %v2978_v42 }
 0x5a4   : > { %2750 = vmatpush1.bf16.msra.mxu1 %v2749_v15  ;;  %1958 = vmatprep.mubr.f32.mxu0 %v1725_v63 }
 0x5a5   : > { %2751 = vmatprep.subr.bf16.mxu1 %v3034_v10  ;;  %v1727_v10 = vsel %vm1053_vm2, %v2953_v59, %v2958_v26  ;;  %v1667_v59 = vpop.permute.xlu1 %1666 }
 0x5a6   : > { %v1637_v44 = vpop.permute.xlu0 %1636 }
 0x5a7   : > { %1959 = vmatmul.mubr.f32.gmra.mrb[36].mxu0 %v1708_v28  ;;  %v1726_v14 = vsel %vm1718_vm4, %v1717_v22, %v1637_v44 }
 0x5a8   : > { %2753 = vmatpush1.bf16.msra.mxu1 %v2752_v20  ;;  %1963 = vmatprep.mubr.f32.mxu0 %v1726_v14 }
 0x5aa   : > { %v1669_v2 = vpop.permute.xlu0 %1668 }
 0x5ab   : > { %2034 = vmatmul.mubr.f32.vlgmr.msra.gmra.mrb[16].mxu1 %v1727_v10  ;;  %1964 = vmatmul.mubr.f32.gmra.mrb[38].mxu0 %v1709_v35  ;;  %v1734_v3 = vsel %vm1053_vm2, %v1637_v44, %v1669_v2 }
 0x5ac   : > { %2357 = vmatprep.mubr.msk.f32.mxu1 %vm675_vm8, %v3997_v62  ;;  %v2998_v62 = vunpack.i.l.bf16 %v4324_v48 }
 0x5ae   : > { %v1731_v53 = vsel %vm1053_vm2, %v2993_v60, %v2998_v62 }
 0x5af   : > { %2039 = vmatmul.mubr.f32.gmra.mrb[18].mxu1 %v1728_v33 }
 0x5b0   : > { %2358 = vmatprep.mubr.msk.f32.mxu1 %vm675_vm8, %v4039_v31  ;;  %v2999_v31 = vunpack.i.h.bf16 %v4324_v48 }
 0x5b3   : > { %2044 = vmatmul.mubr.f32.gmra.mrb[20].mxu1 %v1729_v27 }
 0x5b4   : > { %2359 = vmatprep.mubr.msk.f32.mxu1 %vm675_vm8, %v4021_v16  ;;  %v1732_v16 = vsel %vm1053_vm2, %v2994_v38, %v2999_v31 }
 0x5b7   : > { %2049 = vmatmul.mubr.f32.gmra.mrb[22].mxu1 %v1730_v17 }
 0x5b8   : > { %2360 = vmatprep.mubr.msk.f32.mxu1 %vm675_vm8, %v4088_v49  ;;  %v1733_v49 = vsel %vm1053_vm2, %v1635_v36, %v1667_v59 }
 0x5bb   : > { %2054 = vmatmul.mubr.f32.gmra.mrb[24].mxu1 %v1731_v53 }
 0x5bc   : > { %2361 = vmatprep.mubr.msk.f32.mxu1 %vm675_vm8, %v4062_v41 }
 0x5bf   : > { %2059 = vmatmul.mubr.f32.gmra.mrb[26].mxu1 %v1732_v16 }
 0x5c0   : > { %2362 = vmatprep.mubr.msk.f32.mxu1 %vm675_vm8, %v4127_v6 }
 0x5c3   : > { %2064 = vmatmul.mubr.f32.gmra.mrb[28].mxu1 %v1733_v49 }
 0x5c4   : > { %2363 = vmatprep.mubr.msk.f32.mxu1 %vm675_vm8, %v1453_v51 }
 0x5c7   : > { %2069 = vmatmul.mubr.f32.gmra.mrb[30].mxu1 %v1734_v3 }
 0x64a   : > { %v2477_v41 = vpop.f32.mrb[0].mxu1 }
 0x64b   : > { %v2478_v23 = vpop.f32.mrb[1].mxu1 }
 0x64c   : > { %v2479_v40 = vadd.f32 %v2478_v23, %v2477_v41 }
 0x64e   : > { %v2480_v32 = vpop.f32.mrb[2].mxu1 }
 0x64f   : > { %v2481_v30 = vpop.f32.mrb[3].mxu1 }
 0x650   : > { %v2482_v34 = vadd.f32 %v2481_v30, %v2480_v32 }
 0x652   : > { %v2483_v45 = vpop.f32.mrb[4].mxu1 }
 0x653   : > { %v2484_v4 = vpop.f32.mrb[5].mxu1 }
 0x654   : > { %v2485_v43 = vadd.f32 %v2484_v4, %v2483_v45 }
 0x656   : > { %v2486_v6 = vpop.f32.mrb[6].mxu1 }
 0x657   : > { %v2487_v46 = vpop.f32.mrb[7].mxu1 }
 0x658   : > { %v2488_v56 = vadd.f32 %v2487_v46, %v2486_v6 }
 0x65a   : > { %v2489_v9 = vpop.f32.mrb[8].mxu1 }
 0x65b   : > { %v2490_v57 = vpop.f32.mrb[9].mxu1 }
 0x65c   : > { %v2491_v55 = vadd.f32 %v2490_v57, %v2489_v9 }
 0x65e   : > { %v2492_v48 = vpop.f32.mrb[10].mxu1 }
 0x65f   : > { %v2493_v47 = vpop.f32.mrb[11].mxu1 }
 0x660   : > { %v2494_v58 = vadd.f32 %v2493_v47, %v2492_v48 }
 0x662   : > { %v2495_v38 = vpop.f32.mrb[12].mxu1  ;;  %v2533_v60 = vpop.f32.mrb[24].mxu0 }
 0x663   : > { %v2496_v61 = vpop.f32.mrb[13].mxu1  ;;  %v2534_v7 = vpop.f32.mrb[25].mxu0 }
 0x664   : > { %v2497_v8 = vadd.f32 %v2496_v61, %v2495_v38  ;;  %v2535_v11 = vadd.f32 %v2534_v7, %v2533_v60 }
 0x666   : > { %v2498_v21 = vpop.f32.mrb[14].mxu1  ;;  %v2536_v54 = vpop.f32.mrb[26].mxu0  ;;  %v1931_v52 = vadd.f32 %v2535_v11, %v2479_v40 }
 0x667   : > { %v2499_v18 = vpop.f32.mrb[15].mxu1  ;;  %v2537_v19 = vpop.f32.mrb[27].mxu0 }
 0x668   : > { %v2500_v29 = vadd.f32 %v2499_v18, %v2498_v21  ;;  %v2538_v12 = vadd.f32 %v2537_v19, %v2536_v54 }
 0x66a   : > { %v2539_v15 = vpop.f32.mrb[28].mxu0  ;;  %v1936_v1 = vadd.f32 %v2538_v12, %v2482_v34 }
 0x66b   : > { %v2540_v25 = vpop.f32.mrb[29].mxu0 }
 0x66c   : > { %v2541_v5 = vadd.f32 %v2540_v25, %v2539_v15 }
 0x66e   : > { %v2542_v36 = vpop.f32.mrb[30].mxu0  ;;  %v1941_v37 = vadd.f32 %v2541_v5, %v2485_v43 }
 0x66f   : > { %v2543_v0 = vpop.f32.mrb[31].mxu0 }
 0x670   : > { %v2544_v63 = vadd.f32 %v2543_v0, %v2542_v36 }
 0x672   : > { %v2545_v39 = vpop.f32.mrb[32].mxu0  ;;  %v1946_v20 = vadd.f32 %v2544_v63, %v2488_v56 }
 0x673   : > { %v2546_v26 = vpop.f32.mrb[33].mxu0 }
 0x674   : > { %v2547_v22 = vadd.f32 %v2546_v26, %v2545_v39 }
 0x676   : > { %v2548_v44 = vpop.f32.mrb[34].mxu0  ;;  %v1951_v28 = vadd.f32 %v2547_v22, %v2491_v55 }
 0x677   : > { %v2549_v14 = vpop.f32.mrb[35].mxu0 }
 0x678   : > { %v2550_v24 = vadd.f32 %v2549_v14, %v2548_v44 }
 0x67a   : > { %v2551_v10 = vpop.f32.mrb[36].mxu0  ;;  %v1956_v35 = vadd.f32 %v2550_v24, %v2494_v58 }
 0x67b   : > { %v2552_v42 = vpop.f32.mrb[37].mxu0 }
 0x67c   : > { %v2553_v33 = vadd.f32 %v2552_v42, %v2551_v10 }
 0x67e   : > { %v2035_v50 = vpop.f32.mrb[16].mxu1  ;;  %v2554_v27 = vpop.f32.mrb[38].mxu0  ;;  %v1961_v62 = vadd.f32 %v2553_v33, %v2497_v8 }
 0x67f   : > { %v4407_v17 = vadd.f32 %v2035_v50, %v1931_v52  ;;  %v2037_v31 = vpop.f32.mrb[17].mxu1  ;;  %v2555_v53 = vpop.f32.mrb[39].mxu0 }
 0x680   : > { %v2556_v16 = vadd.f32 %v2555_v53, %v2554_v27 }
 0x681   : > { %v2074_v6 = vsel %vm729_vm14, %v4407_v17, 0.0 }
 0x682   : > { %v2040_v59 = vpop.f32.mrb[18].mxu1  ;;  %v1966_v51 = vadd.f32 %v2556_v16, %v2500_v29 }
 0x683   : > { %v4409_v49 = vadd.f32 %v2040_v59, %v1936_v1  ;;  %v2042_v2 = vpop.f32.mrb[19].mxu1 }
 0x685   : > { %v2075_v45 = vsel %vm729_vm14, %v4409_v49, 0.0 }
 0x686   : > { %v2045_v3 = vpop.f32.mrb[20].mxu1  ;;  %v2076_v56 = vadd.f32 %v2075_v45, %v2074_v6 }
 0x687   : > { %v4411_v41 = vadd.f32 %v2045_v3, %v1941_v37  ;;  %v2047_v23 = vpop.f32.mrb[21].mxu1 }
 0x689   : > { %v2077_v46 = vsel %vm729_vm14, %v4411_v41, 0.0 }
 0x68a   : > { %v2050_v40 = vpop.f32.mrb[22].mxu1  ;;  %v2078_v47 = vadd.f32 %v2077_v46, %v2076_v56 }
 0x68b   : > { %v4413_v32 = vadd.f32 %v2050_v40, %v1946_v20  ;;  %v2052_v30 = vpop.f32.mrb[23].mxu1 }
 0x68d   : > { %v2079_v57 = vsel %vm729_vm14, %v4413_v32, 0.0 }
 0x68e   : > { %v2055_v34 = vpop.f32.mrb[24].mxu1  ;;  %v2080_v38 = vadd.f32 %v2079_v57, %v2078_v47 }
 0x68f   : > { %v4417_v4 = vadd.f32 %v2055_v34, %v1951_v28  ;;  %v2057_v43 = vpop.f32.mrb[25].mxu1 }
 0x691   : > { %v2081_v58 = vsel %vm729_vm14, %v4417_v4, 0.0 }
 0x692   : > { %v2060_v9 = vpop.f32.mrb[26].mxu1  ;;  %v2082_v11 = vadd.f32 %v2081_v58, %v2080_v38 }
 0x693   : > { %v4425_v55 = vadd.f32 %v2060_v9, %v1956_v35  ;;  %v2062_v48 = vpop.f32.mrb[27].mxu1 }
 0x695   : > { %v2083_v61 = vsel %vm729_vm14, %v4425_v55, 0.0 }
 0x696   : > { %v2065_v60 = vpop.f32.mrb[28].mxu1  ;;  %v2084_v54 = vadd.f32 %v2083_v61, %v2082_v11 }
 0x697   : > { %v4431_v7 = vadd.f32 %v2065_v60, %v1961_v62  ;;  %v2067_v8 = vpop.f32.mrb[29].mxu1 }
 0x699   : > { %v2085_v21 = vsel %vm729_vm14, %v4431_v7, 0.0 }
 0x69a   : > { %v2070_v52 = vpop.f32.mrb[30].mxu1  ;;  %v2086_v29 = vadd.f32 %v2085_v21, %v2084_v54 }
 0x69b   : > { %v4435_v18 = vadd.f32 %v2070_v52, %v1966_v51  ;;  %v2072_v19 = vpop.f32.mrb[31].mxu1 }
 0x69d   : > { %v2087_v12 = vsel %vm729_vm14, %v4435_v18, 0.0 }
 0x69e   : > { %v2088_v15 = vadd.f32 %v2087_v12, %v2086_v29 }
 0x6a0   : > { %v2089_v1 = vrot.slane %v2088_v15, 4 }
 0x6a2   : > { %v2090_v25 = vadd.f32 %v2089_v1, %v2088_v15 }
 0x6a4   : > { %v2091_v5 = vrot.slane %v2090_v25, 2 }
 0x6a6   : > { %v2092_v36 = vadd.f32 %v2091_v5, %v2090_v25 }
 0x6a8   : > { %v2093_v37 = vrot.slane %v2092_v36, 1 }
 0x6aa   : > { %v2094_v0 = vadd.f32 %v2093_v37, %v2092_v36 }
 0x6ac   : > { %2100 = vrot.lane.b32.xlu0 %v2094_v0, %s3019_s20  ;;  %2096 = vrot.lane.b32.xlu1 %v2094_v0, %s3022_s19 }
 0x6b0   : > { %2108 = vrot.lane.b32.xlu0 %v2094_v0, %s3027_s9  ;;  %2104 = vrot.lane.b32.xlu1 %v2094_v0, %s3028_s10 }
 0x6b4   : > { %2116 = vrot.lane.b32.xlu0 %v2094_v0, %s3025_s24  ;;  %2112 = vrot.lane.b32.xlu1 %v2094_v0, %s3029_s11 }
 0x6b8   : > { %2120 = vrot.lane.b32.xlu1 %v2094_v0, %s3023_s22 }
 0x71e   : > { %v2101_v63 = vpop.permute.xlu0 %2100  ;;  %v2097_v39 = vpop.permute.xlu1 %2096 }
 0x71f   : > { %v2099_v20 = vadd.f32 %v2097_v39, %v2094_v0 }
 0x721   : > { %v2103_v26 = vadd.f32 %v2101_v63, %v2099_v20 }
 0x722   : > { %v2109_v22 = vpop.permute.xlu0 %2108  ;;  %v2105_v44 = vpop.permute.xlu1 %2104 }
 0x723   : > { %v2107_v28 = vadd.f32 %v2105_v44, %v2103_v26 }
 0x725   : > { %v2111_v14 = vadd.f32 %v2109_v22, %v2107_v28 }
 0x726   : > { %v2113_v24 = vpop.permute.xlu1 %2112  ;;  %v2117_v35 = vpop.permute.xlu0 %2116 }
 0x727   : > { %v2115_v10 = vadd.f32 %v2113_v24, %v2111_v14 }
 0x729   : > { %v2119_v42 = vadd.f32 %v2117_v35, %v2115_v10 }
 0x72a   : > { %v2121_v33 = vpop.permute.xlu1 %2120 }
 0x72b   : > { %v2123_v50 = vadd.f32 %v2121_v33, %v2119_v42 }
 0x72d   : > { %v2124_v27 = vmul.f32 0.001953125, %v2123_v50 }
 0x72f   : > { %2129 = vrot.lane.b32.xlu1 %v2124_v27, %s3030_s14  ;;  %2126 = vrot.lane.b32.xlu0 %v2124_v27, %s3031_s16 }
 0x733   : > { %2135 = vrot.lane.b32.xlu1 %v2124_v27, %s3021_s18  ;;  %2132 = vrot.lane.b32.xlu0 %v2124_v27, %s3020_s21 }
 0x737   : > { %2141 = vrot.lane.b32.xlu1 %v2124_v27, %s3032_s17  ;;  %2138 = vrot.lane.b32.xlu0 %v2124_v27, %s3024_s23 }
 0x73b   : > { %2144 = vrot.lane.b32.xlu0 %v2124_v27, %s4563_s8 }
 0x7a1   : > { %v2130_v62 = vpop.permute.xlu1 %2129  ;;  %v2127_v31 = vpop.permute.xlu0 %2126 }
 0x7a2   : > { %v2147_v53 = vsel %vm1046_vm0, %v2124_v27, %v2127_v31 }
 0x7a3   : > { %v2148_v59 = vsel %vm1048_vm1, %v2147_v53, %v2130_v62 }
 0x7a5   : > { %v2136_v16 = vpop.permute.xlu1 %2135  ;;  %v2133_v51 = vpop.permute.xlu0 %2132 }
 0x7a6   : > { %v2149_v2 = vsel %vm720_vm13, %v2148_v59, %v2133_v51 }
 0x7a7   : > { %v2150_v3 = vsel %vm693_vm9, %v2149_v2, %v2136_v16 }
 0x7a9   : > { %v2139_v23 = vpop.permute.xlu0 %2138  ;;  %v2142_v40 = vpop.permute.xlu1 %2141 }
 0x7aa   : > { %v2151_v30 = vsel %vm179_vm5, %v2150_v3, %v2139_v23 }
 0x7ab   : > { %v2152_v34 = vsel %vm1053_vm2, %v2151_v30, %v2142_v40 }
 0x7ad   : > { %v2145_v45 = vpop.permute.xlu0 %2144 }
 0x7ae   : > { %v2153_v43 = vsel %vm1055_vm3, %v2152_v34, %v2145_v45 }
 0x7af   : > { %v2157_v6 = vrot.slane %v2153_v43, %v3602_v13 }
 0x7b1   : > { %v4462_v46 = vsub.f32 %v4407_v17, %v2157_v6  ;;  %v4465_v56 = vsub.f32 %v4409_v49, %v2157_v6  ;;  %v4468_v9 = vsub.f32 %v4411_v41, %v2157_v6  ;;  %v4471_v57 = vsub.f32 %v4413_v32, %v2157_v6 }
 0x7b2   : > { %v4474_v48 = vsub.f32 %v4417_v4, %v2157_v6  ;;  %v4483_v49 = vsub.f32 %v4425_v55, %v2157_v6  ;;  %v4490_v60 = vsub.f32 %v4431_v7, %v2157_v6  ;;  %v4496_v55 = vsub.f32 %v4435_v18, %v2157_v6 }
 0x7b3   : > { %v2166_v47 = vmul.f32 %v4462_v46, %v4462_v46  ;;  %v2167_v58 = vmul.f32 %v4465_v56, %v4465_v56  ;;  %v2168_v17 = vmul.f32 %v4468_v9, %v4468_v9  ;;  %v2169_v41 = vmul.f32 %v4471_v57, %v4471_v57 }
 0x7b4   : > { %v2170_v61 = vmul.f32 %v4474_v48, %v4474_v48  ;;  %v2171_v21 = vmul.f32 %v4483_v49, %v4483_v49  ;;  %v2172_v19 = vmul.f32 %v4490_v60, %v4490_v60  ;;  %v2173_v12 = vmul.f32 %v4496_v55, %v4496_v55 }
 0x7b5   : > { %v2174_v32 = vsel %vm729_vm14, %v2166_v47, 0.0  ;;  %v2175_v4 = vsel %vm729_vm14, %v2167_v58, 0.0  ;;  %v2177_v8 = vsel %vm729_vm14, %v2168_v17, 0.0  ;;  %v2179_v54 = vsel %vm729_vm14, %v2169_v41, 0.0 }
 0x7b6   : > { %v2176_v38 = vadd.f32 %v2175_v4, %v2174_v32  ;;  %v2181_v7 = vsel %vm729_vm14, %v2170_v61, 0.0  ;;  %v2183_v15 = vsel %vm729_vm14, %v2171_v21, 0.0  ;;  %v2185_v18 = vsel %vm729_vm14, %v2172_v19, 0.0 }
 0x7b7   : > { %v2187_v5 = vsel %vm729_vm14, %v2173_v12, 0.0 }
 0x7b8   : > { %v2178_v11 = vadd.f32 %v2177_v8, %v2176_v38 }
 0x7ba   : > { %v2180_v52 = vadd.f32 %v2179_v54, %v2178_v11 }
 0x7bc   : > { %v2182_v29 = vadd.f32 %v2181_v7, %v2180_v52 }
 0x7be   : > { %v2184_v1 = vadd.f32 %v2183_v15, %v2182_v29 }
 0x7c0   : > { %v2186_v25 = vadd.f32 %v2185_v18, %v2184_v1 }
 0x7c2   : > { %v2188_v36 = vadd.f32 %v2187_v5, %v2186_v25 }
 0x7c4   : > { %v2189_v37 = vrot.slane %v2188_v36, 4 }
 0x7c6   : > { %v2190_v0 = vadd.f32 %v2189_v37, %v2188_v36 }
 0x7c8   : > { %v2191_v63 = vrot.slane %v2190_v0, 2 }
 0x7ca   : > { %v2192_v39 = vadd.f32 %v2191_v63, %v2190_v0 }
 0x7cc   : > { %v2193_v20 = vrot.slane %v2192_v39, 1 }
 0x7ce   : > { %v2194_v26 = vadd.f32 %v2193_v20, %v2192_v39 }
 0x7d0   : > { %2200 = vrot.lane.b32.xlu0 %v2194_v26, %s3019_s20  ;;  %2196 = vrot.lane.b32.xlu1 %v2194_v26, %s3022_s19  ;;  %s4564_s20 = sshll.u32 %s4566_s13, 6 }
 0x7d1   : > { %s170_s19 = scalar_lea.vmem %s4558_s3, %s4564_s20 }
 0x7d4   : > { %2208 = vrot.lane.b32.xlu0 %v2194_v26, %s3027_s9  ;;  %2204 = vrot.lane.b32.xlu1 %v2194_v26, %s3028_s10 }
 0x7d8   : > { %2216 = vrot.lane.b32.xlu0 %v2194_v26, %s3025_s24  ;;  %2212 = vrot.lane.b32.xlu1 %v2194_v26, %s3029_s11 }
 0x7dc   : > { %2220 = vrot.lane.b32.xlu1 %v2194_v26, %s3023_s22 }
 0x842   : > { %v2201_v22 = vpop.permute.xlu0 %2200  ;;  %v2197_v44 = vpop.permute.xlu1 %2196 }
 0x843   : > { %v2199_v28 = vadd.f32 %v2197_v44, %v2194_v26 }
 0x845   : > { %v2203_v14 = vadd.f32 %v2201_v22, %v2199_v28 }
 0x846   : > { %v2209_v24 = vpop.permute.xlu0 %2208  ;;  %v2205_v10 = vpop.permute.xlu1 %2204 }
 0x847   : > { %v2207_v35 = vadd.f32 %v2205_v10, %v2203_v14 }
 0x849   : > { %v2211_v42 = vadd.f32 %v2209_v24, %v2207_v35 }
 0x84a   : > { %v2213_v33 = vpop.permute.xlu1 %2212  ;;  %v2217_v27 = vpop.permute.xlu0 %2216 }
 0x84b   : > { %v2215_v50 = vadd.f32 %v2213_v33, %v2211_v42 }
 0x84d   : > { %v2219_v62 = vadd.f32 %v2217_v27, %v2215_v50 }
 0x84e   : > { %v2221_v31 = vpop.permute.xlu1 %2220 }
 0x84f   : > { %v2223_v53 = vadd.f32 %v2221_v31, %v2219_v62 }
 0x851   : > { %v2224_v16 = vmul.f32 0.001953125, %v2223_v53 }
 0x853   : > { %v2225_v59 = vadd.f32 1e-05, %v2224_v16 }
 0x855   : > { %3007 = vrsqrt.f32 %v2225_v59 }
 0x85f   : > { %v3008_v51 = vpop.eup %3007 }
 0x860   : > { %2231 = vrot.lane.b32.xlu1 %v3008_v51, %s3030_s14  ;;  %2228 = vrot.lane.b32.xlu0 %v3008_v51, %s3031_s16 }
 0x864   : > { %2237 = vrot.lane.b32.xlu1 %v3008_v51, %s3021_s18  ;;  %2234 = vrot.lane.b32.xlu0 %v3008_v51, %s3020_s21 }
 0x868   : > { %2243 = vrot.lane.b32.xlu1 %v3008_v51, %s3032_s17  ;;  %2240 = vrot.lane.b32.xlu0 %v3008_v51, %s3024_s23 }
 0x86c   : > { %2246 = vrot.lane.b32.xlu0 %v3008_v51, %s4563_s8 }
 0x8d2   : > { %v2232_v2 = vpop.permute.xlu1 %2231  ;;  %v2229_v3 = vpop.permute.xlu0 %2228 }
 0x8d3   : > { %v2249_v23 = vsel %vm1046_vm0, %v3008_v51, %v2229_v3 }
 0x8d4   : > { %v2250_v30 = vsel %vm1048_vm1, %v2249_v23, %v2232_v2 }
 0x8d6   : > { %v2238_v40 = vpop.permute.xlu1 %2237  ;;  %v2235_v34 = vpop.permute.xlu0 %2234 }
 0x8d7   : > { %v2251_v45 = vsel %vm720_vm13, %v2250_v30, %v2235_v34 }
 0x8d8   : > { %v2252_v43 = vsel %vm693_vm9, %v2251_v45, %v2238_v40 }
 0x8da   : > { %v2241_v6 = vpop.permute.xlu0 %2240  ;;  %v2244_v47 = vpop.permute.xlu1 %2243 }
 0x8db   : > { %v2253_v58 = vsel %vm179_vm5, %v2252_v43, %v2241_v6 }
 0x8dc   : > { %v2254_v17 = vsel %vm1053_vm2, %v2253_v58, %v2244_v47 }
 0x8de   : > { %v2247_v41 = vpop.permute.xlu0 %2246 }
 0x8df   : > { %v2255_v32 = vsel %vm1055_vm3, %v2254_v17, %v2247_v41 }
 0x8e0   : > { %v2259_v4 = vrot.slane %v2255_v32, %v3602_v13 }
 0x8e2   : > { %v2260_v38 = vmul.f32 %v2259_v4, %v4462_v46  ;;  %v2261_v61 = vmul.f32 %v2259_v4, %v4465_v56  ;;  %v2262_v8 = vmul.f32 %v2259_v4, %v4468_v9  ;;  %v2263_v11 = vmul.f32 %v2259_v4, %v4471_v57 }
 0x8e3   : > { %v2264_v21 = vmul.f32 %v2259_v4, %v4474_v48  ;;  %v2265_v54 = vmul.f32 %v2259_v4, %v4483_v49  ;;  %v2266_v52 = vmul.f32 %v2259_v4, %v4490_v60  ;;  %v2267_v13 = vmul.f32 %v2259_v4, %v4496_v55 }
 0x8e4   : > { %v2268_v46 = vmax.f32 %v2260_v38, 0.0  ;;  %v2269_v19 = vmax.f32 %v2261_v61, 0.0  ;;  %v2270_v56 = vmax.f32 %v2262_v8, 0.0  ;;  %v2271_v7 = vmax.f32 %v2263_v11, 0.0 }
 0x8e5   : > { %v2272_v9 = vmax.f32 %v2264_v21, 0.0  ;;  %v2273_v29 = vmax.f32 %v2265_v54, 0.0  ;;  %v2274_v57 = vmax.f32 %v2266_v52, 0.0  ;;  %v2275_v12 = vmax.f32 %v2267_v13, 0.0 }
 0x8e6   : > { %2276 = vst.msk [vmem:[%s170_s19] sm:$0xff] %vm729_vm14, %v2268_v46  ;;  %2277 = vst.msk [vmem:[%s170_s19 + $0x8] sm:$0xff] %vm729_vm14, %v2269_v19 }
 0x8e7   : > { %2278 = vst.msk [vmem:[%s170_s19 + $0x10] sm:$0xff] %vm729_vm14, %v2270_v56  ;;  %2279 = vst.msk [vmem:[%s170_s19 + $0x18] sm:$0xff] %vm729_vm14, %v2271_v7 }
 0x8e8   : > { %2280 = vst.msk [vmem:[%s170_s19 + $0x20] sm:$0xff] %vm729_vm14, %v2272_v9  ;;  %2281 = vst.msk [vmem:[%s170_s19 + $0x28] sm:$0xff] %vm729_vm14, %v2273_v29 }
 0x8e9   : > { %2282 = vst.msk [vmem:[%s170_s19 + $0x30] sm:$0xff] %vm729_vm14, %v2274_v57  ;;  %2283 = vst.msk [vmem:[%s170_s19 + $0x38] sm:$0xff] %vm729_vm14, %v2275_v12 }
 0x8ea PF: > { %s13_s12 = sadd.s32 1, %s3015_s12  }
 0x8eb   : > { %p10_p4 = scmp.ge.s32.totalorder %s13_s12, 4  }
 0x8ed   :  { %12 = sbr.rel (!%p10_p4) target bundleno = 1 (0x1), region = 68 }

</bundles_post_ra>
